<compile_context>
chip_gen: v5e
topology: v5e:2x2
jax: 0.10.0
libtpu: 0.0.40
codegen_flags: <defaults>
</compile_context>

<pallas_src>
import jax
import jax.numpy as jnp
from jax.experimental import pallas as pl
from jax.experimental.pallas import tpu as pltpu

BN_EPS = 1e-5


def conv_bn_relu_kernel(x_ref, w_ref, shift_ref, o_ref):
    """Fused 3x3 valid conv + folded-BN shift + ReLU for one batch element.

    x_ref:     (1, Cin, H, W)      VMEM  float32   (W in lanes)
    w_ref:     (Cout*Cin*KH*KW,)   SMEM  float32   (BN scale already folded in)
    shift_ref: (Cout,)             SMEM  float32   (beta + (bias - mean) * scale)
    o_ref:     (1, Cout, OH, OW)   VMEM  float32
    """
    _, cin, h, w = x_ref.shape
    _, cout, oh, ow = o_ref.shape
    n_kh = h - oh + 1
    n_kw = w - ow + 1

    x = x_ref[0]                                        # (Cin, H, W)
    for co in range(cout):
        acc = jnp.zeros((oh, ow), jnp.float32)
        for ci in range(cin):
            xc = x[ci]                                  # (H, W), W in lanes
            for kh in range(n_kh):
                xh = xc[kh:kh + oh, :]                  # sublane shift
                for kw in range(n_kw):
                    # scalar weight from SMEM, broadcast multiply-add on the VPU
                    wk = w_ref[((co * cin + ci) * n_kh + kh) * n_kw + kw]
                    acc = acc + wk * xh[:, kw:kw + ow]
        o_ref[0, co, :, :] = jnp.maximum(acc + shift_ref[co], 0.0)


def conv_bn_relu(x_nchw, conv_w, conv_b, gamma, beta, running_mean, running_var):
    """x_nchw: (N, Cin, H, W) float32 — PyTorch layout, returned in NCHW too.

    conv_w: (Cout, Cin, KH, KW), conv_b/gamma/beta/mean/var: (Cout,)
    """
    N, Cin, H, W = x_nchw.shape
    Cout, _, KH, KW = conv_w.shape
    OH, OW = H - KH + 1, W - KW + 1

    # Fold eval-mode BatchNorm into the conv weights / a per-channel shift.
    # TODO(synk): training-mode BN (batch statistics + running-stat update) is
    #             not implemented; this matches module.eval() semantics.
    inv_std = 1.0 / jnp.sqrt(running_var + BN_EPS)
    scale = gamma * inv_std                                      # (Cout,)
    w_folded = conv_w * scale[:, None, None, None]               # (Cout,Cin,KH,KW)
    shift = beta + (conv_b - running_mean) * scale               # (Cout,)
    w_flat = w_folded.reshape(-1).astype(jnp.float32)            # (Cout*Cin*KH*KW,)

    return pl.pallas_call(
        conv_bn_relu_kernel,
        out_shape=jax.ShapeDtypeStruct((N, Cout, OH, OW), jnp.float32),
        grid=(N,),
        in_specs=[
            pl.BlockSpec((1, Cin, H, W), lambda n: (n, 0, 0, 0)),
            pl.BlockSpec(memory_space=pltpu.MemorySpace.SMEM),
            pl.BlockSpec(memory_space=pltpu.MemorySpace.SMEM),
        ],
        out_specs=pl.BlockSpec((1, Cout, OH, OW), lambda n: (n, 0, 0, 0)),
        compiler_params=pltpu.CompilerParams(
            dimension_semantics=("parallel",)),
    )(x_nchw, w_flat, shift)


def reference(x_nchw, conv_w, conv_b, gamma, beta, running_mean, running_var):
    """Pure-JAX reference for correctness checking."""
    y = jax.lax.conv_general_dilated(
        x_nchw, conv_w, window_strides=(1, 1), padding="VALID",
        dimension_numbers=("NCHW", "OIHW", "NCHW"))
    y = y + conv_b.reshape(1, -1, 1, 1)
    inv_std = 1.0 / jnp.sqrt(running_var + BN_EPS)
    y = (y - running_mean.reshape(1, -1, 1, 1)) * (gamma * inv_std).reshape(1, -1, 1, 1) \
        + beta.reshape(1, -1, 1, 1)
    return jnp.maximum(y, 0.0)


if __name__ == "__main__":
    key = jax.random.PRNGKey(0)
    k_x, k_w, k_b, k_g, k_be, k_m, k_v = jax.random.split(key, 7)

    # Small shapes consistent with Conv2d(3, 3, kernel_size=3).
    N, Cin, H, W = 2, 3, 16, 16
    Cout, KH, KW = 3, 3, 3

    x = jax.random.normal(k_x, (N, Cin, H, W), jnp.float32)

    # Deterministic synthetic parameters (no checkpoint loading).
    conv_w = 0.1 * jax.random.normal(k_w, (Cout, Cin, KH, KW), jnp.float32)
    conv_b = 0.05 * jax.random.normal(k_b, (Cout,), jnp.float32)
    gamma = 1.0 + 0.1 * jax.random.normal(k_g, (Cout,), jnp.float32)
    beta = 0.1 * jax.random.normal(k_be, (Cout,), jnp.float32)
    running_mean = 0.1 * jax.random.normal(k_m, (Cout,), jnp.float32)
    running_var = 1.0 + 0.1 * jax.random.uniform(k_v, (Cout,), jnp.float32)

    out = conv_bn_relu(x, conv_w, conv_b, gamma, beta, running_mean, running_var)
    out = jax.block_until_ready(out)

    ref = reference(x, conv_w, conv_b, gamma, beta, running_mean, running_var)
    assert out.shape == (N, Cout, H - KH + 1, W - KW + 1), out.shape
    assert jnp.allclose(out, ref, atol=1e-4, rtol=1e-4), float(jnp.max(jnp.abs(out - ref)))

    print("KERNEL_OK")
</pallas_src>

<mosaic_0001>
module attributes {stable_mosaic.version = 11 : i64} {
  func.func @conv_bn_relu_kernel(%arg0: i32, %arg1: memref<1x3x16x16xf32, #tpu.memory_space<vmem>>, %arg2: memref<81xf32, #tpu.memory_space<smem>>, %arg3: memref<3xf32, #tpu.memory_space<smem>>, %arg4: memref<1x3x14x14xf32, #tpu.memory_space<vmem>>) attributes {dimension_semantics = [#tpu.dimension_semantics<parallel>], iteration_bounds = array<i64: 2>, scalar_prefetch = 0 : i64, scratch_operands = 0 : i64, tpu.core_type = #tpu.core_type<tc>, window_params = [{transform_indices = @transform_0, window_bounds = array<i64: 1, 3, 16, 16>}, {transform_indices = @transform_1, window_bounds = array<i64: 81>}, {transform_indices = @transform_2, window_bounds = array<i64: 3>}, {transform_indices = @transform_3, window_bounds = array<i64: 1, 3, 14, 14>}]} {
    %c0 = arith.constant 0 : index
    %c0_0 = arith.constant 0 : index
    %c0_1 = arith.constant 0 : index
    %c0_2 = arith.constant 0 : index
    %0 = vector.load %arg1[%c0, %c0_0, %c0_1, %c0_2] : memref<1x3x16x16xf32, #tpu.memory_space<vmem>>, vector<1x3x16x16xf32>
    %1 = vector.shape_cast %0 : vector<1x3x16x16xf32> to vector<3x16x16xf32>
    %cst = arith.constant 0.000000e+00 : f32
    %2 = vector.broadcast %cst : f32 to vector<14x14xf32>
    %3 = vector.extract_strided_slice %1 {offsets = [0, 0, 0], sizes = [1, 16, 16], strides = [1, 1, 1]} : vector<3x16x16xf32> to vector<1x16x16xf32>
    %4 = vector.shape_cast %3 : vector<1x16x16xf32> to vector<16x16xf32>
    %5 = vector.extract_strided_slice %4 {offsets = [0, 0], sizes = [14, 16], strides = [1, 1]} : vector<16x16xf32> to vector<14x16xf32>
    %c0_3 = arith.constant 0 : index
    %6 = memref.load %arg2[%c0_3] : memref<81xf32, #tpu.memory_space<smem>>
    %7 = vector.extract_strided_slice %5 {offsets = [0, 0], sizes = [14, 14], strides = [1, 1]} : vector<14x16xf32> to vector<14x14xf32>
    %8 = vector.broadcast %6 : f32 to vector<14x14xf32>
    %9 = arith.mulf %8, %7 : vector<14x14xf32>
    %10 = arith.addf %2, %9 : vector<14x14xf32>
    %c1 = arith.constant 1 : index
    %11 = memref.load %arg2[%c1] : memref<81xf32, #tpu.memory_space<smem>>
    %12 = vector.extract_strided_slice %5 {offsets = [0, 1], sizes = [14, 14], strides = [1, 1]} : vector<14x16xf32> to vector<14x14xf32>
    %13 = vector.broadcast %11 : f32 to vector<14x14xf32>
    %14 = arith.mulf %13, %12 : vector<14x14xf32>
    %15 = arith.addf %10, %14 : vector<14x14xf32>
    %c2 = arith.constant 2 : index
    %16 = memref.load %arg2[%c2] : memref<81xf32, #tpu.memory_space<smem>>
    %17 = vector.extract_strided_slice %5 {offsets = [0, 2], sizes = [14, 14], strides = [1, 1]} : vector<14x16xf32> to vector<14x14xf32>
    %18 = vector.broadcast %16 : f32 to vector<14x14xf32>
    %19 = arith.mulf %18, %17 : vector<14x14xf32>
    %20 = arith.addf %15, %19 : vector<14x14xf32>
    %21 = vector.extract_strided_slice %4 {offsets = [1, 0], sizes = [14, 16], strides = [1, 1]} : vector<16x16xf32> to vector<14x16xf32>
    %c3 = arith.constant 3 : index
    %22 = memref.load %arg2[%c3] : memref<81xf32, #tpu.memory_space<smem>>
    %23 = vector.extract_strided_slice %21 {offsets = [0, 0], sizes = [14, 14], strides = [1, 1]} : vector<14x16xf32> to vector<14x14xf32>
    %24 = vector.broadcast %22 : f32 to vector<14x14xf32>
    %25 = arith.mulf %24, %23 : vector<14x14xf32>
    %26 = arith.addf %20, %25 : vector<14x14xf32>
    %c4 = arith.constant 4 : index
    %27 = memref.load %arg2[%c4] : memref<81xf32, #tpu.memory_space<smem>>
    %28 = vector.extract_strided_slice %21 {offsets = [0, 1], sizes = [14, 14], strides = [1, 1]} : vector<14x16xf32> to vector<14x14xf32>
    %29 = vector.broadcast %27 : f32 to vector<14x14xf32>
    %30 = arith.mulf %29, %28 : vector<14x14xf32>
    %31 = arith.addf %26, %30 : vector<14x14xf32>
    %c5 = arith.constant 5 : index
    %32 = memref.load %arg2[%c5] : memref<81xf32, #tpu.memory_space<smem>>
    %33 = vector.extract_strided_slice %21 {offsets = [0, 2], sizes = [14, 14], strides = [1, 1]} : vector<14x16xf32> to vector<14x14xf32>
    %34 = vector.broadcast %32 : f32 to vector<14x14xf32>
    %35 = arith.mulf %34, %33 : vector<14x14xf32>
    %36 = arith.addf %31, %35 : vector<14x14xf32>
    %37 = vector.extract_strided_slice %4 {offsets = [2, 0], sizes = [14, 16], strides = [1, 1]} : vector<16x16xf32> to vector<14x16xf32>
    %c6 = arith.constant 6 : index
    %38 = memref.load %arg2[%c6] : memref<81xf32, #tpu.memory_space<smem>>
    %39 = vector.extract_strided_slice %37 {offsets = [0, 0], sizes = [14, 14], strides = [1, 1]} : vector<14x16xf32> to vector<14x14xf32>
    %40 = vector.broadcast %38 : f32 to vector<14x14xf32>
    %41 = arith.mulf %40, %39 : vector<14x14xf32>
    %42 = arith.addf %36, %41 : vector<14x14xf32>
    %c7 = arith.constant 7 : index
    %43 = memref.load %arg2[%c7] : memref<81xf32, #tpu.memory_space<smem>>
    %44 = vector.extract_strided_slice %37 {offsets = [0, 1], sizes = [14, 14], strides = [1, 1]} : vector<14x16xf32> to vector<14x14xf32>
    %45 = vector.broadcast %43 : f32 to vector<14x14xf32>
    %46 = arith.mulf %45, %44 : vector<14x14xf32>
    %47 = arith.addf %42, %46 : vector<14x14xf32>
    %c8 = arith.constant 8 : index
    %48 = memref.load %arg2[%c8] : memref<81xf32, #tpu.memory_space<smem>>
    %49 = vector.extract_strided_slice %37 {offsets = [0, 2], sizes = [14, 14], strides = [1, 1]} : vector<14x16xf32> to vector<14x14xf32>
    %50 = vector.broadcast %48 : f32 to vector<14x14xf32>
    %51 = arith.mulf %50, %49 : vector<14x14xf32>
    %52 = arith.addf %47, %51 : vector<14x14xf32>
    %53 = vector.extract_strided_slice %1 {offsets = [1, 0, 0], sizes = [1, 16, 16], strides = [1, 1, 1]} : vector<3x16x16xf32> to vector<1x16x16xf32>
    %54 = vector.shape_cast %53 : vector<1x16x16xf32> to vector<16x16xf32>
    %55 = vector.extract_strided_slice %54 {offsets = [0, 0], sizes = [14, 16], strides = [1, 1]} : vector<16x16xf32> to vector<14x16xf32>
    %c9 = arith.constant 9 : index
    %56 = memref.load %arg2[%c9] : memref<81xf32, #tpu.memory_space<smem>>
    %57 = vector.extract_strided_slice %55 {offsets = [0, 0], sizes = [14, 14], strides = [1, 1]} : vector<14x16xf32> to vector<14x14xf32>
    %58 = vector.broadcast %56 : f32 to vector<14x14xf32>
    %59 = arith.mulf %58, %57 : vector<14x14xf32>
    %60 = arith.addf %52, %59 : vector<14x14xf32>
    %c10 = arith.constant 10 : index
    %61 = memref.load %arg2[%c10] : memref<81xf32, #tpu.memory_space<smem>>
    %62 = vector.extract_strided_slice %55 {offsets = [0, 1], sizes = [14, 14], strides = [1, 1]} : vector<14x16xf32> to vector<14x14xf32>
    %63 = vector.broadcast %61 : f32 to vector<14x14xf32>
    %64 = arith.mulf %63, %62 : vector<14x14xf32>
    %65 = arith.addf %60, %64 : vector<14x14xf32>
    %c11 = arith.constant 11 : index
    %66 = memref.load %arg2[%c11] : memref<81xf32, #tpu.memory_space<smem>>
    %67 = vector.extract_strided_slice %55 {offsets = [0, 2], sizes = [14, 14], strides = [1, 1]} : vector<14x16xf32> to vector<14x14xf32>
    %68 = vector.broadcast %66 : f32 to vector<14x14xf32>
    %69 = arith.mulf %68, %67 : vector<14x14xf32>
    %70 = arith.addf %65, %69 : vector<14x14xf32>
    %71 = vector.extract_strided_slice %54 {offsets = [1, 0], sizes = [14, 16], strides = [1, 1]} : vector<16x16xf32> to vector<14x16xf32>
    %c12 = arith.constant 12 : index
    %72 = memref.load %arg2[%c12] : memref<81xf32, #tpu.memory_space<smem>>
    %73 = vector.extract_strided_slice %71 {offsets = [0, 0], sizes = [14, 14], strides = [1, 1]} : vector<14x16xf32> to vector<14x14xf32>
    %74 = vector.broadcast %72 : f32 to vector<14x14xf32>
    %75 = arith.mulf %74, %73 : vector<14x14xf32>
    %76 = arith.addf %70, %75 : vector<14x14xf32>
    %c13 = arith.constant 13 : index
    %77 = memref.load %arg2[%c13] : memref<81xf32, #tpu.memory_space<smem>>
    %78 = vector.extract_strided_slice %71 {offsets = [0, 1], sizes = [14, 14], strides = [1, 1]} : vector<14x16xf32> to vector<14x14xf32>
    %79 = vector.broadcast %77 : f32 to vector<14x14xf32>
    %80 = arith.mulf %79, %78 : vector<14x14xf32>
    %81 = arith.addf %76, %80 : vector<14x14xf32>
    %c14 = arith.constant 14 : index
    %82 = memref.load %arg2[%c14] : memref<81xf32, #tpu.memory_space<smem>>
    %83 = vector.extract_strided_slice %71 {offsets = [0, 2], sizes = [14, 14], strides = [1, 1]} : vector<14x16xf32> to vector<14x14xf32>
    %84 = vector.broadcast %82 : f32 to vector<14x14xf32>
    %85 = arith.mulf %84, %83 : vector<14x14xf32>
    %86 = arith.addf %81, %85 : vector<14x14xf32>
    %87 = vector.extract_strided_slice %54 {offsets = [2, 0], sizes = [14, 16], strides = [1, 1]} : vector<16x16xf32> to vector<14x16xf32>
    %c15 = arith.constant 15 : index
    %88 = memref.load %arg2[%c15] : memref<81xf32, #tpu.memory_space<smem>>
    %89 = vector.extract_strided_slice %87 {offsets = [0, 0], sizes = [14, 14], strides = [1, 1]} : vector<14x16xf32> to vector<14x14xf32>
    %90 = vector.broadcast %88 : f32 to vector<14x14xf32>
    %91 = arith.mulf %90, %89 : vector<14x14xf32>
    %92 = arith.addf %86, %91 : vector<14x14xf32>
    %c16 = arith.constant 16 : index
    %93 = memref.load %arg2[%c16] : memref<81xf32, #tpu.memory_space<smem>>
    %94 = vector.extract_strided_slice %87 {offsets = [0, 1], sizes = [14, 14], strides = [1, 1]} : vector<14x16xf32> to vector<14x14xf32>
    %95 = vector.broadcast %93 : f32 to vector<14x14xf32>
    %96 = arith.mulf %95, %94 : vector<14x14xf32>
    %97 = arith.addf %92, %96 : vector<14x14xf32>
    %c17 = arith.constant 17 : index
    %98 = memref.load %arg2[%c17] : memref<81xf32, #tpu.memory_space<smem>>
    %99 = vector.extract_strided_slice %87 {offsets = [0, 2], sizes = [14, 14], strides = [1, 1]} : vector<14x16xf32> to vector<14x14xf32>
    %100 = vector.broadcast %98 : f32 to vector<14x14xf32>
    %101 = arith.mulf %100, %99 : vector<14x14xf32>
    %102 = arith.addf %97, %101 : vector<14x14xf32>
    %103 = vector.extract_strided_slice %1 {offsets = [2, 0, 0], sizes = [1, 16, 16], strides = [1, 1, 1]} : vector<3x16x16xf32> to vector<1x16x16xf32>
    %104 = vector.shape_cast %103 : vector<1x16x16xf32> to vector<16x16xf32>
    %105 = vector.extract_strided_slice %104 {offsets = [0, 0], sizes = [14, 16], strides = [1, 1]} : vector<16x16xf32> to vector<14x16xf32>
    %c18 = arith.constant 18 : index
    %106 = memref.load %arg2[%c18] : memref<81xf32, #tpu.memory_space<smem>>
    %107 = vector.extract_strided_slice %105 {offsets = [0, 0], sizes = [14, 14], strides = [1, 1]} : vector<14x16xf32> to vector<14x14xf32>
    %108 = vector.broadcast %106 : f32 to vector<14x14xf32>
    %109 = arith.mulf %108, %107 : vector<14x14xf32>
    %110 = arith.addf %102, %109 : vector<14x14xf32>
    %c19 = arith.constant 19 : index
    %111 = memref.load %arg2[%c19] : memref<81xf32, #tpu.memory_space<smem>>
    %112 = vector.extract_strided_slice %105 {offsets = [0, 1], sizes = [14, 14], strides = [1, 1]} : vector<14x16xf32> to vector<14x14xf32>
    %113 = vector.broadcast %111 : f32 to vector<14x14xf32>
    %114 = arith.mulf %113, %112 : vector<14x14xf32>
    %115 = arith.addf %110, %114 : vector<14x14xf32>
    %c20 = arith.constant 20 : index
    %116 = memref.load %arg2[%c20] : memref<81xf32, #tpu.memory_space<smem>>
    %117 = vector.extract_strided_slice %105 {offsets = [0, 2], sizes = [14, 14], strides = [1, 1]} : vector<14x16xf32> to vector<14x14xf32>
    %118 = vector.broadcast %116 : f32 to vector<14x14xf32>
    %119 = arith.mulf %118, %117 : vector<14x14xf32>
    %120 = arith.addf %115, %119 : vector<14x14xf32>
    %121 = vector.extract_strided_slice %104 {offsets = [1, 0], sizes = [14, 16], strides = [1, 1]} : vector<16x16xf32> to vector<14x16xf32>
    %c21 = arith.constant 21 : index
    %122 = memref.load %arg2[%c21] : memref<81xf32, #tpu.memory_space<smem>>
    %123 = vector.extract_strided_slice %121 {offsets = [0, 0], sizes = [14, 14], strides = [1, 1]} : vector<14x16xf32> to vector<14x14xf32>
    %124 = vector.broadcast %122 : f32 to vector<14x14xf32>
    %125 = arith.mulf %124, %123 : vector<14x14xf32>
    %126 = arith.addf %120, %125 : vector<14x14xf32>
    %c22 = arith.constant 22 : index
    %127 = memref.load %arg2[%c22] : memref<81xf32, #tpu.memory_space<smem>>
    %128 = vector.extract_strided_slice %121 {offsets = [0, 1], sizes = [14, 14], strides = [1, 1]} : vector<14x16xf32> to vector<14x14xf32>
    %129 = vector.broadcast %127 : f32 to vector<14x14xf32>
    %130 = arith.mulf %129, %128 : vector<14x14xf32>
    %131 = arith.addf %126, %130 : vector<14x14xf32>
    %c23 = arith.constant 23 : index
    %132 = memref.load %arg2[%c23] : memref<81xf32, #tpu.memory_space<smem>>
    %133 = vector.extract_strided_slice %121 {offsets = [0, 2], sizes = [14, 14], strides = [1, 1]} : vector<14x16xf32> to vector<14x14xf32>
    %134 = vector.broadcast %132 : f32 to vector<14x14xf32>
    %135 = arith.mulf %134, %133 : vector<14x14xf32>
    %136 = arith.addf %131, %135 : vector<14x14xf32>
    %137 = vector.extract_strided_slice %104 {offsets = [2, 0], sizes = [14, 16], strides = [1, 1]} : vector<16x16xf32> to vector<14x16xf32>
    %c24 = arith.constant 24 : index
    %138 = memref.load %arg2[%c24] : memref<81xf32, #tpu.memory_space<smem>>
    %139 = vector.extract_strided_slice %137 {offsets = [0, 0], sizes = [14, 14], strides = [1, 1]} : vector<14x16xf32> to vector<14x14xf32>
    %140 = vector.broadcast %138 : f32 to vector<14x14xf32>
    %141 = arith.mulf %140, %139 : vector<14x14xf32>
    %142 = arith.addf %136, %141 : vector<14x14xf32>
    %c25 = arith.constant 25 : index
    %143 = memref.load %arg2[%c25] : memref<81xf32, #tpu.memory_space<smem>>
    %144 = vector.extract_strided_slice %137 {offsets = [0, 1], sizes = [14, 14], strides = [1, 1]} : vector<14x16xf32> to vector<14x14xf32>
    %145 = vector.broadcast %143 : f32 to vector<14x14xf32>
    %146 = arith.mulf %145, %144 : vector<14x14xf32>
    %147 = arith.addf %142, %146 : vector<14x14xf32>
    %c26 = arith.constant 26 : index
    %148 = memref.load %arg2[%c26] : memref<81xf32, #tpu.memory_space<smem>>
    %149 = vector.extract_strided_slice %137 {offsets = [0, 2], sizes = [14, 14], strides = [1, 1]} : vector<14x16xf32> to vector<14x14xf32>
    %150 = vector.broadcast %148 : f32 to vector<14x14xf32>
    %151 = arith.mulf %150, %149 : vector<14x14xf32>
    %152 = arith.addf %147, %151 : vector<14x14xf32>
    %c0_4 = arith.constant 0 : index
    %153 = memref.load %arg3[%c0_4] : memref<3xf32, #tpu.memory_space<smem>>
    %154 = vector.broadcast %153 : f32 to vector<14x14xf32>
    %155 = arith.addf %152, %154 : vector<14x14xf32>
    %cst_5 = arith.constant 0.000000e+00 : f32
    %156 = vector.broadcast %cst_5 : f32 to vector<14x14xf32>
    %157 = arith.maximumf %155, %156 : vector<14x14xf32>
    %c0_6 = arith.constant 0 : index
    %c0_7 = arith.constant 0 : index
    %c0_8 = arith.constant 0 : index
    %c0_9 = arith.constant 0 : index
    %158 = vector.load %arg4[%c0_6, %c0_7, %c0_8, %c0_9] : memref<1x3x14x14xf32, #tpu.memory_space<vmem>>, vector<1x1x14x14xf32>
    %159 = vector.shape_cast %158 : vector<1x1x14x14xf32> to vector<14x14xf32>
    %160 = vector.shape_cast %157 : vector<14x14xf32> to vector<1x1x14x14xf32>
    tpu.vector_store %arg4[%c0_6, %c0_7, %c0_8, %c0_9], %160 {strides = array<i32>} : memref<1x3x14x14xf32, #tpu.memory_space<vmem>>, vector<1x1x14x14xf32>,
    %cst_10 = arith.constant 0.000000e+00 : f32
    %161 = vector.broadcast %cst_10 : f32 to vector<14x14xf32>
    %162 = vector.extract_strided_slice %1 {offsets = [0, 0, 0], sizes = [1, 16, 16], strides = [1, 1, 1]} : vector<3x16x16xf32> to vector<1x16x16xf32>
    %163 = vector.shape_cast %162 : vector<1x16x16xf32> to vector<16x16xf32>
    %164 = vector.extract_strided_slice %163 {offsets = [0, 0], sizes = [14, 16], strides = [1, 1]} : vector<16x16xf32> to vector<14x16xf32>
    %c27 = arith.constant 27 : index
    %165 = memref.load %arg2[%c27] : memref<81xf32, #tpu.memory_space<smem>>
    %166 = vector.extract_strided_slice %164 {offsets = [0, 0], sizes = [14, 14], strides = [1, 1]} : vector<14x16xf32> to vector<14x14xf32>
    %167 = vector.broadcast %165 : f32 to vector<14x14xf32>
    %168 = arith.mulf %167, %166 : vector<14x14xf32>
    %169 = arith.addf %161, %168 : vector<14x14xf32>
    %c28 = arith.constant 28 : index
    %170 = memref.load %arg2[%c28] : memref<81xf32, #tpu.memory_space<smem>>
    %171 = vector.extract_strided_slice %164 {offsets = [0, 1], sizes = [14, 14], strides = [1, 1]} : vector<14x16xf32> to vector<14x14xf32>
    %172 = vector.broadcast %170 : f32 to vector<14x14xf32>
    %173 = arith.mulf %172, %171 : vector<14x14xf32>
    %174 = arith.addf %169, %173 : vector<14x14xf32>
    %c29 = arith.constant 29 : index
    %175 = memref.load %arg2[%c29] : memref<81xf32, #tpu.memory_space<smem>>
    %176 = vector.extract_strided_slice %164 {offsets = [0, 2], sizes = [14, 14], strides = [1, 1]} : vector<14x16xf32> to vector<14x14xf32>
    %177 = vector.broadcast %175 : f32 to vector<14x14xf32>
    %178 = arith.mulf %177, %176 : vector<14x14xf32>
    %179 = arith.addf %174, %178 : vector<14x14xf32>
    %180 = vector.extract_strided_slice %163 {offsets = [1, 0], sizes = [14, 16], strides = [1, 1]} : vector<16x16xf32> to vector<14x16xf32>
    %c30 = arith.constant 30 : index
    %181 = memref.load %arg2[%c30] : memref<81xf32, #tpu.memory_space<smem>>
    %182 = vector.extract_strided_slice %180 {offsets = [0, 0], sizes = [14, 14], strides = [1, 1]} : vector<14x16xf32> to vector<14x14xf32>
    %183 = vector.broadcast %181 : f32 to vector<14x14xf32>
    %184 = arith.mulf %183, %182 : vector<14x14xf32>
    %185 = arith.addf %179, %184 : vector<14x14xf32>
    %c31 = arith.constant 31 : index
    %186 = memref.load %arg2[%c31] : memref<81xf32, #tpu.memory_space<smem>>
    %187 = vector.extract_strided_slice %180 {offsets = [0, 1], sizes = [14, 14], strides = [1, 1]} : vector<14x16xf32> to vector<14x14xf32>
    %188 = vector.broadcast %186 : f32 to vector<14x14xf32>
    %189 = arith.mulf %188, %187 : vector<14x14xf32>
    %190 = arith.addf %185, %189 : vector<14x14xf32>
    %c32 = arith.constant 32 : index
    %191 = memref.load %arg2[%c32] : memref<81xf32, #tpu.memory_space<smem>>
    %192 = vector.extract_strided_slice %180 {offsets = [0, 2], sizes = [14, 14], strides = [1, 1]} : vector<14x16xf32> to vector<14x14xf32>
    %193 = vector.broadcast %191 : f32 to vector<14x14xf32>
    %194 = arith.mulf %193, %192 : vector<14x14xf32>
    %195 = arith.addf %190, %194 : vector<14x14xf32>
    %196 = vector.extract_strided_slice %163 {offsets = [2, 0], sizes = [14, 16], strides = [1, 1]} : vector<16x16xf32> to vector<14x16xf32>
    %c33 = arith.constant 33 : index
    %197 = memref.load %arg2[%c33] : memref<81xf32, #tpu.memory_space<smem>>
    %198 = vector.extract_strided_slice %196 {offsets = [0, 0], sizes = [14, 14], strides = [1, 1]} : vector<14x16xf32> to vector<14x14xf32>
    %199 = vector.broadcast %197 : f32 to vector<14x14xf32>
    %200 = arith.mulf %199, %198 : vector<14x14xf32>
    %201 = arith.addf %195, %200 : vector<14x14xf32>
    %c34 = arith.constant 34 : index
    %202 = memref.load %arg2[%c34] : memref<81xf32, #tpu.memory_space<smem>>
    %203 = vector.extract_strided_slice %196 {offsets = [0, 1], sizes = [14, 14], strides = [1, 1]} : vector<14x16xf32> to vector<14x14xf32>
    %204 = vector.broadcast %202 : f32 to vector<14x14xf32>
    %205 = arith.mulf %204, %203 : vector<14x14xf32>
    %206 = arith.addf %201, %205 : vector<14x14xf32>
    %c35 = arith.constant 35 : index
    %207 = memref.load %arg2[%c35] : memref<81xf32, #tpu.memory_space<smem>>
    %208 = vector.extract_strided_slice %196 {offsets = [0, 2], sizes = [14, 14], strides = [1, 1]} : vector<14x16xf32> to vector<14x14xf32>
    %209 = vector.broadcast %207 : f32 to vector<14x14xf32>
    %210 = arith.mulf %209, %208 : vector<14x14xf32>
    %211 = arith.addf %206, %210 : vector<14x14xf32>
    %212 = vector.extract_strided_slice %1 {offsets = [1, 0, 0], sizes = [1, 16, 16], strides = [1, 1, 1]} : vector<3x16x16xf32> to vector<1x16x16xf32>
    %213 = vector.shape_cast %212 : vector<1x16x16xf32> to vector<16x16xf32>
    %214 = vector.extract_strided_slice %213 {offsets = [0, 0], sizes = [14, 16], strides = [1, 1]} : vector<16x16xf32> to vector<14x16xf32>
    %c36 = arith.constant 36 : index
    %215 = memref.load %arg2[%c36] : memref<81xf32, #tpu.memory_space<smem>>
    %216 = vector.extract_strided_slice %214 {offsets = [0, 0], sizes = [14, 14], strides = [1, 1]} : vector<14x16xf32> to vector<14x14xf32>
    %217 = vector.broadcast %215 : f32 to vector<14x14xf32>
    %218 = arith.mulf %217, %216 : vector<14x14xf32>
    %219 = arith.addf %211, %218 : vector<14x14xf32>
    %c37 = arith.constant 37 : index
    %220 = memref.load %arg2[%c37] : memref<81xf32, #tpu.memory_space<smem>>
    %221 = vector.extract_strided_slice %214 {offsets = [0, 1], sizes = [14, 14], strides = [1, 1]} : vector<14x16xf32> to vector<14x14xf32>
    %222 = vector.broadcast %220 : f32 to vector<14x14xf32>
    %223 = arith.mulf %222, %221 : vector<14x14xf32>
    %224 = arith.addf %219, %223 : vector<14x14xf32>
    %c38 = arith.constant 38 : index
    %225 = memref.load %arg2[%c38] : memref<81xf32, #tpu.memory_space<smem>>
    %226 = vector.extract_strided_slice %214 {offsets = [0, 2], sizes = [14, 14], strides = [1, 1]} : vector<14x16xf32> to vector<14x14xf32>
    %227 = vector.broadcast %225 : f32 to vector<14x14xf32>
    %228 = arith.mulf %227, %226 : vector<14x14xf32>
    %229 = arith.addf %224, %228 : vector<14x14xf32>
    %230 = vector.extract_strided_slice %213 {offsets = [1, 0], sizes = [14, 16], strides = [1, 1]} : vector<16x16xf32> to vector<14x16xf32>
    %c39 = arith.constant 39 : index
    %231 = memref.load %arg2[%c39] : memref<81xf32, #tpu.memory_space<smem>>
    %232 = vector.extract_strided_slice %230 {offsets = [0, 0], sizes = [14, 14], strides = [1, 1]} : vector<14x16xf32> to vector<14x14xf32>
    %233 = vector.broadcast %231 : f32 to vector<14x14xf32>
    %234 = arith.mulf %233, %232 : vector<14x14xf32>
    %235 = arith.addf %229, %234 : vector<14x14xf32>
    %c40 = arith.constant 40 : index
    %236 = memref.load %arg2[%c40] : memref<81xf32, #tpu.memory_space<smem>>
    %237 = vector.extract_strided_slice %230 {offsets = [0, 1], sizes = [14, 14], strides = [1, 1]} : vector<14x16xf32> to vector<14x14xf32>
    %238 = vector.broadcast %236 : f32 to vector<14x14xf32>
    %239 = arith.mulf %238, %237 : vector<14x14xf32>
    %240 = arith.addf %235, %239 : vector<14x14xf32>
    %c41 = arith.constant 41 : index
    %241 = memref.load %arg2[%c41] : memref<81xf32, #tpu.memory_space<smem>>
    %242 = vector.extract_strided_slice %230 {offsets = [0, 2], sizes = [14, 14], strides = [1, 1]} : vector<14x16xf32> to vector<14x14xf32>
    %243 = vector.broadcast %241 : f32 to vector<14x14xf32>
    %244 = arith.mulf %243, %242 : vector<14x14xf32>
    %245 = arith.addf %240, %244 : vector<14x14xf32>
    %246 = vector.extract_strided_slice %213 {offsets = [2, 0], sizes = [14, 16], strides = [1, 1]} : vector<16x16xf32> to vector<14x16xf32>
    %c42 = arith.constant 42 : index
    %247 = memref.load %arg2[%c42] : memref<81xf32, #tpu.memory_space<smem>>
    %248 = vector.extract_strided_slice %246 {offsets = [0, 0], sizes = [14, 14], strides = [1, 1]} : vector<14x16xf32> to vector<14x14xf32>
    %249 = vector.broadcast %247 : f32 to vector<14x14xf32>
    %250 = arith.mulf %249, %248 : vector<14x14xf32>
    %251 = arith.addf %245, %250 : vector<14x14xf32>
    %c43 = arith.constant 43 : index
    %252 = memref.load %arg2[%c43] : memref<81xf32, #tpu.memory_space<smem>>
    %253 = vector.extract_strided_slice %246 {offsets = [0, 1], sizes = [14, 14], strides = [1, 1]} : vector<14x16xf32> to vector<14x14xf32>
    %254 = vector.broadcast %252 : f32 to vector<14x14xf32>
    %255 = arith.mulf %254, %253 : vector<14x14xf32>
    %256 = arith.addf %251, %255 : vector<14x14xf32>
    %c44 = arith.constant 44 : index
    %257 = memref.load %arg2[%c44] : memref<81xf32, #tpu.memory_space<smem>>
    %258 = vector.extract_strided_slice %246 {offsets = [0, 2], sizes = [14, 14], strides = [1, 1]} : vector<14x16xf32> to vector<14x14xf32>
    %259 = vector.broadcast %257 : f32 to vector<14x14xf32>
    %260 = arith.mulf %259, %258 : vector<14x14xf32>
    %261 = arith.addf %256, %260 : vector<14x14xf32>
    %262 = vector.extract_strided_slice %1 {offsets = [2, 0, 0], sizes = [1, 16, 16], strides = [1, 1, 1]} : vector<3x16x16xf32> to vector<1x16x16xf32>
    %263 = vector.shape_cast %262 : vector<1x16x16xf32> to vector<16x16xf32>
    %264 = vector.extract_strided_slice %263 {offsets = [0, 0], sizes = [14, 16], strides = [1, 1]} : vector<16x16xf32> to vector<14x16xf32>
    %c45 = arith.constant 45 : index
    %265 = memref.load %arg2[%c45] : memref<81xf32, #tpu.memory_space<smem>>
    %266 = vector.extract_strided_slice %264 {offsets = [0, 0], sizes = [14, 14], strides = [1, 1]} : vector<14x16xf32> to vector<14x14xf32>
    %267 = vector.broadcast %265 : f32 to vector<14x14xf32>
    %268 = arith.mulf %267, %266 : vector<14x14xf32>
    %269 = arith.addf %261, %268 : vector<14x14xf32>
    %c46 = arith.constant 46 : index
    %270 = memref.load %arg2[%c46] : memref<81xf32, #tpu.memory_space<smem>>
    %271 = vector.extract_strided_slice %264 {offsets = [0, 1], sizes = [14, 14], strides = [1, 1]} : vector<14x16xf32> to vector<14x14xf32>
    %272 = vector.broadcast %270 : f32 to vector<14x14xf32>
    %273 = arith.mulf %272, %271 : vector<14x14xf32>
    %274 = arith.addf %269, %273 : vector<14x14xf32>
    %c47 = arith.constant 47 : index
    %275 = memref.load %arg2[%c47] : memref<81xf32, #tpu.memory_space<smem>>
    %276 = vector.extract_strided_slice %264 {offsets = [0, 2], sizes = [14, 14], strides = [1, 1]} : vector<14x16xf32> to vector<14x14xf32>
    %277 = vector.broadcast %275 : f32 to vector<14x14xf32>
    %278 = arith.mulf %277, %276 : vector<14x14xf32>
    %279 = arith.addf %274, %278 : vector<14x14xf32>
    %280 = vector.extract_strided_slice %263 {offsets = [1, 0], sizes = [14, 16], strides = [1, 1]} : vector<16x16xf32> to vector<14x16xf32>
    %c48 = arith.constant 48 : index
    %281 = memref.load %arg2[%c48] : memref<81xf32, #tpu.memory_space<smem>>
    %282 = vector.extract_strided_slice %280 {offsets = [0, 0], sizes = [14, 14], strides = [1, 1]} : vector<14x16xf32> to vector<14x14xf32>
    %283 = vector.broadcast %281 : f32 to vector<14x14xf32>
    %284 = arith.mulf %283, %282 : vector<14x14xf32>
    %285 = arith.addf %279, %284 : vector<14x14xf32>
    %c49 = arith.constant 49 : index
    %286 = memref.load %arg2[%c49] : memref<81xf32, #tpu.memory_space<smem>>
    %287 = vector.extract_strided_slice %280 {offsets = [0, 1], sizes = [14, 14], strides = [1, 1]} : vector<14x16xf32> to vector<14x14xf32>
    %288 = vector.broadcast %286 : f32 to vector<14x14xf32>
    %289 = arith.mulf %288, %287 : vector<14x14xf32>
    %290 = arith.addf %285, %289 : vector<14x14xf32>
    %c50 = arith.constant 50 : index
    %291 = memref.load %arg2[%c50] : memref<81xf32, #tpu.memory_space<smem>>
    %292 = vector.extract_strided_slice %280 {offsets = [0, 2], sizes = [14, 14], strides = [1, 1]} : vector<14x16xf32> to vector<14x14xf32>
    %293 = vector.broadcast %291 : f32 to vector<14x14xf32>
    %294 = arith.mulf %293, %292 : vector<14x14xf32>
    %295 = arith.addf %290, %294 : vector<14x14xf32>
    %296 = vector.extract_strided_slice %263 {offsets = [2, 0], sizes = [14, 16], strides = [1, 1]} : vector<16x16xf32> to vector<14x16xf32>
    %c51 = arith.constant 51 : index
    %297 = memref.load %arg2[%c51] : memref<81xf32, #tpu.memory_space<smem>>
    %298 = vector.extract_strided_slice %296 {offsets = [0, 0], sizes = [14, 14], strides = [1, 1]} : vector<14x16xf32> to vector<14x14xf32>
    %299 = vector.broadcast %297 : f32 to vector<14x14xf32>
    %300 = arith.mulf %299, %298 : vector<14x14xf32>
    %301 = arith.addf %295, %300 : vector<14x14xf32>
    %c52 = arith.constant 52 : index
    %302 = memref.load %arg2[%c52] : memref<81xf32, #tpu.memory_space<smem>>
    %303 = vector.extract_strided_slice %296 {offsets = [0, 1], sizes = [14, 14], strides = [1, 1]} : vector<14x16xf32> to vector<14x14xf32>
    %304 = vector.broadcast %302 : f32 to vector<14x14xf32>
    %305 = arith.mulf %304, %303 : vector<14x14xf32>
    %306 = arith.addf %301, %305 : vector<14x14xf32>
    %c53 = arith.constant 53 : index
    %307 = memref.load %arg2[%c53] : memref<81xf32, #tpu.memory_space<smem>>
    %308 = vector.extract_strided_slice %296 {offsets = [0, 2], sizes = [14, 14], strides = [1, 1]} : vector<14x16xf32> to vector<14x14xf32>
    %309 = vector.broadcast %307 : f32 to vector<14x14xf32>
    %310 = arith.mulf %309, %308 : vector<14x14xf32>
    %311 = arith.addf %306, %310 : vector<14x14xf32>
    %c1_11 = arith.constant 1 : index
    %312 = memref.load %arg3[%c1_11] : memref<3xf32, #tpu.memory_space<smem>>
    %313 = vector.broadcast %312 : f32 to vector<14x14xf32>
    %314 = arith.addf %311, %313 : vector<14x14xf32>
    %cst_12 = arith.constant 0.000000e+00 : f32
    %315 = vector.broadcast %cst_12 : f32 to vector<14x14xf32>
    %316 = arith.maximumf %314, %315 : vector<14x14xf32>
    %c0_13 = arith.constant 0 : index
    %c1_14 = arith.constant 1 : index
    %c0_15 = arith.constant 0 : index
    %c0_16 = arith.constant 0 : index
    %317 = vector.load %arg4[%c0_13, %c1_14, %c0_15, %c0_16] : memref<1x3x14x14xf32, #tpu.memory_space<vmem>>, vector<1x1x14x14xf32>
    %318 = vector.shape_cast %317 : vector<1x1x14x14xf32> to vector<14x14xf32>
    %319 = vector.shape_cast %316 : vector<14x14xf32> to vector<1x1x14x14xf32>
    tpu.vector_store %arg4[%c0_13, %c1_14, %c0_15, %c0_16], %319 {strides = array<i32>} : memref<1x3x14x14xf32, #tpu.memory_space<vmem>>, vector<1x1x14x14xf32>,
    %cst_17 = arith.constant 0.000000e+00 : f32
    %320 = vector.broadcast %cst_17 : f32 to vector<14x14xf32>
    %321 = vector.extract_strided_slice %1 {offsets = [0, 0, 0], sizes = [1, 16, 16], strides = [1, 1, 1]} : vector<3x16x16xf32> to vector<1x16x16xf32>
    %322 = vector.shape_cast %321 : vector<1x16x16xf32> to vector<16x16xf32>
    %323 = vector.extract_strided_slice %322 {offsets = [0, 0], sizes = [14, 16], strides = [1, 1]} : vector<16x16xf32> to vector<14x16xf32>
    %c54 = arith.constant 54 : index
    %324 = memref.load %arg2[%c54] : memref<81xf32, #tpu.memory_space<smem>>
    %325 = vector.extract_strided_slice %323 {offsets = [0, 0], sizes = [14, 14], strides = [1, 1]} : vector<14x16xf32> to vector<14x14xf32>
    %326 = vector.broadcast %324 : f32 to vector<14x14xf32>
    %327 = arith.mulf %326, %325 : vector<14x14xf32>
    %328 = arith.addf %320, %327 : vector<14x14xf32>
    %c55 = arith.constant 55 : index
    %329 = memref.load %arg2[%c55] : memref<81xf32, #tpu.memory_space<smem>>
    %330 = vector.extract_strided_slice %323 {offsets = [0, 1], sizes = [14, 14], strides = [1, 1]} : vector<14x16xf32> to vector<14x14xf32>
    %331 = vector.broadcast %329 : f32 to vector<14x14xf32>
    %332 = arith.mulf %331, %330 : vector<14x14xf32>
    %333 = arith.addf %328, %332 : vector<14x14xf32>
    %c56 = arith.constant 56 : index
    %334 = memref.load %arg2[%c56] : memref<81xf32, #tpu.memory_space<smem>>
    %335 = vector.extract_strided_slice %323 {offsets = [0, 2], sizes = [14, 14], strides = [1, 1]} : vector<14x16xf32> to vector<14x14xf32>
    %336 = vector.broadcast %334 : f32 to vector<14x14xf32>
    %337 = arith.mulf %336, %335 : vector<14x14xf32>
    %338 = arith.addf %333, %337 : vector<14x14xf32>
    %339 = vector.extract_strided_slice %322 {offsets = [1, 0], sizes = [14, 16], strides = [1, 1]} : vector<16x16xf32> to vector<14x16xf32>
    %c57 = arith.constant 57 : index
    %340 = memref.load %arg2[%c57] : memref<81xf32, #tpu.memory_space<smem>>
    %341 = vector.extract_strided_slice %339 {offsets = [0, 0], sizes = [14, 14], strides = [1, 1]} : vector<14x16xf32> to vector<14x14xf32>
    %342 = vector.broadcast %340 : f32 to vector<14x14xf32>
    %343 = arith.mulf %342, %341 : vector<14x14xf32>
    %344 = arith.addf %338, %343 : vector<14x14xf32>
    %c58 = arith.constant 58 : index
    %345 = memref.load %arg2[%c58] : memref<81xf32, #tpu.memory_space<smem>>
    %346 = vector.extract_strided_slice %339 {offsets = [0, 1], sizes = [14, 14], strides = [1, 1]} : vector<14x16xf32> to vector<14x14xf32>
    %347 = vector.broadcast %345 : f32 to vector<14x14xf32>
    %348 = arith.mulf %347, %346 : vector<14x14xf32>
    %349 = arith.addf %344, %348 : vector<14x14xf32>
    %c59 = arith.constant 59 : index
    %350 = memref.load %arg2[%c59] : memref<81xf32, #tpu.memory_space<smem>>
    %351 = vector.extract_strided_slice %339 {offsets = [0, 2], sizes = [14, 14], strides = [1, 1]} : vector<14x16xf32> to vector<14x14xf32>
    %352 = vector.broadcast %350 : f32 to vector<14x14xf32>
    %353 = arith.mulf %352, %351 : vector<14x14xf32>
    %354 = arith.addf %349, %353 : vector<14x14xf32>
    %355 = vector.extract_strided_slice %322 {offsets = [2, 0], sizes = [14, 16], strides = [1, 1]} : vector<16x16xf32> to vector<14x16xf32>
    %c60 = arith.constant 60 : index
    %356 = memref.load %arg2[%c60] : memref<81xf32, #tpu.memory_space<smem>>
    %357 = vector.extract_strided_slice %355 {offsets = [0, 0], sizes = [14, 14], strides = [1, 1]} : vector<14x16xf32> to vector<14x14xf32>
    %358 = vector.broadcast %356 : f32 to vector<14x14xf32>
    %359 = arith.mulf %358, %357 : vector<14x14xf32>
    %360 = arith.addf %354, %359 : vector<14x14xf32>
    %c61 = arith.constant 61 : index
    %361 = memref.load %arg2[%c61] : memref<81xf32, #tpu.memory_space<smem>>
    %362 = vector.extract_strided_slice %355 {offsets = [0, 1], sizes = [14, 14], strides = [1, 1]} : vector<14x16xf32> to vector<14x14xf32>
    %363 = vector.broadcast %361 : f32 to vector<14x14xf32>
    %364 = arith.mulf %363, %362 : vector<14x14xf32>
    %365 = arith.addf %360, %364 : vector<14x14xf32>
    %c62 = arith.constant 62 : index
    %366 = memref.load %arg2[%c62] : memref<81xf32, #tpu.memory_space<smem>>
    %367 = vector.extract_strided_slice %355 {offsets = [0, 2], sizes = [14, 14], strides = [1, 1]} : vector<14x16xf32> to vector<14x14xf32>
    %368 = vector.broadcast %366 : f32 to vector<14x14xf32>
    %369 = arith.mulf %368, %367 : vector<14x14xf32>
    %370 = arith.addf %365, %369 : vector<14x14xf32>
    %371 = vector.extract_strided_slice %1 {offsets = [1, 0, 0], sizes = [1, 16, 16], strides = [1, 1, 1]} : vector<3x16x16xf32> to vector<1x16x16xf32>
    %372 = vector.shape_cast %371 : vector<1x16x16xf32> to vector<16x16xf32>
    %373 = vector.extract_strided_slice %372 {offsets = [0, 0], sizes = [14, 16], strides = [1, 1]} : vector<16x16xf32> to vector<14x16xf32>
    %c63 = arith.constant 63 : index
    %374 = memref.load %arg2[%c63] : memref<81xf32, #tpu.memory_space<smem>>
    %375 = vector.extract_strided_slice %373 {offsets = [0, 0], sizes = [14, 14], strides = [1, 1]} : vector<14x16xf32> to vector<14x14xf32>
    %376 = vector.broadcast %374 : f32 to vector<14x14xf32>
    %377 = arith.mulf %376, %375 : vector<14x14xf32>
    %378 = arith.addf %370, %377 : vector<14x14xf32>
    %c64 = arith.constant 64 : index
    %379 = memref.load %arg2[%c64] : memref<81xf32, #tpu.memory_space<smem>>
    %380 = vector.extract_strided_slice %373 {offsets = [0, 1], sizes = [14, 14], strides = [1, 1]} : vector<14x16xf32> to vector<14x14xf32>
    %381 = vector.broadcast %379 : f32 to vector<14x14xf32>
    %382 = arith.mulf %381, %380 : vector<14x14xf32>
    %383 = arith.addf %378, %382 : vector<14x14xf32>
    %c65 = arith.constant 65 : index
    %384 = memref.load %arg2[%c65] : memref<81xf32, #tpu.memory_space<smem>>
    %385 = vector.extract_strided_slice %373 {offsets = [0, 2], sizes = [14, 14], strides = [1, 1]} : vector<14x16xf32> to vector<14x14xf32>
    %386 = vector.broadcast %384 : f32 to vector<14x14xf32>
    %387 = arith.mulf %386, %385 : vector<14x14xf32>
    %388 = arith.addf %383, %387 : vector<14x14xf32>
    %389 = vector.extract_strided_slice %372 {offsets = [1, 0], sizes = [14, 16], strides = [1, 1]} : vector<16x16xf32> to vector<14x16xf32>
    %c66 = arith.constant 66 : index
    %390 = memref.load %arg2[%c66] : memref<81xf32, #tpu.memory_space<smem>>
    %391 = vector.extract_strided_slice %389 {offsets = [0, 0], sizes = [14, 14], strides = [1, 1]} : vector<14x16xf32> to vector<14x14xf32>
    %392 = vector.broadcast %390 : f32 to vector<14x14xf32>
    %393 = arith.mulf %392, %391 : vector<14x14xf32>
    %394 = arith.addf %388, %393 : vector<14x14xf32>
    %c67 = arith.constant 67 : index
    %395 = memref.load %arg2[%c67] : memref<81xf32, #tpu.memory_space<smem>>
    %396 = vector.extract_strided_slice %389 {offsets = [0, 1], sizes = [14, 14], strides = [1, 1]} : vector<14x16xf32> to vector<14x14xf32>
    %397 = vector.broadcast %395 : f32 to vector<14x14xf32>
    %398 = arith.mulf %397, %396 : vector<14x14xf32>
    %399 = arith.addf %394, %398 : vector<14x14xf32>
    %c68 = arith.constant 68 : index
    %400 = memref.load %arg2[%c68] : memref<81xf32, #tpu.memory_space<smem>>
    %401 = vector.extract_strided_slice %389 {offsets = [0, 2], sizes = [14, 14], strides = [1, 1]} : vector<14x16xf32> to vector<14x14xf32>
    %402 = vector.broadcast %400 : f32 to vector<14x14xf32>
    %403 = arith.mulf %402, %401 : vector<14x14xf32>
    %404 = arith.addf %399, %403 : vector<14x14xf32>
    %405 = vector.extract_strided_slice %372 {offsets = [2, 0], sizes = [14, 16], strides = [1, 1]} : vector<16x16xf32> to vector<14x16xf32>
    %c69 = arith.constant 69 : index
    %406 = memref.load %arg2[%c69] : memref<81xf32, #tpu.memory_space<smem>>
    %407 = vector.extract_strided_slice %405 {offsets = [0, 0], sizes = [14, 14], strides = [1, 1]} : vector<14x16xf32> to vector<14x14xf32>
    %408 = vector.broadcast %406 : f32 to vector<14x14xf32>
    %409 = arith.mulf %408, %407 : vector<14x14xf32>
    %410 = arith.addf %404, %409 : vector<14x14xf32>
    %c70 = arith.constant 70 : index
    %411 = memref.load %arg2[%c70] : memref<81xf32, #tpu.memory_space<smem>>
    %412 = vector.extract_strided_slice %405 {offsets = [0, 1], sizes = [14, 14], strides = [1, 1]} : vector<14x16xf32> to vector<14x14xf32>
    %413 = vector.broadcast %411 : f32 to vector<14x14xf32>
    %414 = arith.mulf %413, %412 : vector<14x14xf32>
    %415 = arith.addf %410, %414 : vector<14x14xf32>
    %c71 = arith.constant 71 : index
    %416 = memref.load %arg2[%c71] : memref<81xf32, #tpu.memory_space<smem>>
    %417 = vector.extract_strided_slice %405 {offsets = [0, 2], sizes = [14, 14], strides = [1, 1]} : vector<14x16xf32> to vector<14x14xf32>
    %418 = vector.broadcast %416 : f32 to vector<14x14xf32>
    %419 = arith.mulf %418, %417 : vector<14x14xf32>
    %420 = arith.addf %415, %419 : vector<14x14xf32>
    %421 = vector.extract_strided_slice %1 {offsets = [2, 0, 0], sizes = [1, 16, 16], strides = [1, 1, 1]} : vector<3x16x16xf32> to vector<1x16x16xf32>
    %422 = vector.shape_cast %421 : vector<1x16x16xf32> to vector<16x16xf32>
    %423 = vector.extract_strided_slice %422 {offsets = [0, 0], sizes = [14, 16], strides = [1, 1]} : vector<16x16xf32> to vector<14x16xf32>
    %c72 = arith.constant 72 : index
    %424 = memref.load %arg2[%c72] : memref<81xf32, #tpu.memory_space<smem>>
    %425 = vector.extract_strided_slice %423 {offsets = [0, 0], sizes = [14, 14], strides = [1, 1]} : vector<14x16xf32> to vector<14x14xf32>
    %426 = vector.broadcast %424 : f32 to vector<14x14xf32>
    %427 = arith.mulf %426, %425 : vector<14x14xf32>
    %428 = arith.addf %420, %427 : vector<14x14xf32>
    %c73 = arith.constant 73 : index
    %429 = memref.load %arg2[%c73] : memref<81xf32, #tpu.memory_space<smem>>
    %430 = vector.extract_strided_slice %423 {offsets = [0, 1], sizes = [14, 14], strides = [1, 1]} : vector<14x16xf32> to vector<14x14xf32>
    %431 = vector.broadcast %429 : f32 to vector<14x14xf32>
    %432 = arith.mulf %431, %430 : vector<14x14xf32>
    %433 = arith.addf %428, %432 : vector<14x14xf32>
    %c74 = arith.constant 74 : index
    %434 = memref.load %arg2[%c74] : memref<81xf32, #tpu.memory_space<smem>>
    %435 = vector.extract_strided_slice %423 {offsets = [0, 2], sizes = [14, 14], strides = [1, 1]} : vector<14x16xf32> to vector<14x14xf32>
    %436 = vector.broadcast %434 : f32 to vector<14x14xf32>
    %437 = arith.mulf %436, %435 : vector<14x14xf32>
    %438 = arith.addf %433, %437 : vector<14x14xf32>
    %439 = vector.extract_strided_slice %422 {offsets = [1, 0], sizes = [14, 16], strides = [1, 1]} : vector<16x16xf32> to vector<14x16xf32>
    %c75 = arith.constant 75 : index
    %440 = memref.load %arg2[%c75] : memref<81xf32, #tpu.memory_space<smem>>
    %441 = vector.extract_strided_slice %439 {offsets = [0, 0], sizes = [14, 14], strides = [1, 1]} : vector<14x16xf32> to vector<14x14xf32>
    %442 = vector.broadcast %440 : f32 to vector<14x14xf32>
    %443 = arith.mulf %442, %441 : vector<14x14xf32>
    %444 = arith.addf %438, %443 : vector<14x14xf32>
    %c76 = arith.constant 76 : index
    %445 = memref.load %arg2[%c76] : memref<81xf32, #tpu.memory_space<smem>>
    %446 = vector.extract_strided_slice %439 {offsets = [0, 1], sizes = [14, 14], strides = [1, 1]} : vector<14x16xf32> to vector<14x14xf32>
    %447 = vector.broadcast %445 : f32 to vector<14x14xf32>
    %448 = arith.mulf %447, %446 : vector<14x14xf32>
    %449 = arith.addf %444, %448 : vector<14x14xf32>
    %c77 = arith.constant 77 : index
    %450 = memref.load %arg2[%c77] : memref<81xf32, #tpu.memory_space<smem>>
    %451 = vector.extract_strided_slice %439 {offsets = [0, 2], sizes = [14, 14], strides = [1, 1]} : vector<14x16xf32> to vector<14x14xf32>
    %452 = vector.broadcast %450 : f32 to vector<14x14xf32>
    %453 = arith.mulf %452, %451 : vector<14x14xf32>
    %454 = arith.addf %449, %453 : vector<14x14xf32>
    %455 = vector.extract_strided_slice %422 {offsets = [2, 0], sizes = [14, 16], strides = [1, 1]} : vector<16x16xf32> to vector<14x16xf32>
    %c78 = arith.constant 78 : index
    %456 = memref.load %arg2[%c78] : memref<81xf32, #tpu.memory_space<smem>>
    %457 = vector.extract_strided_slice %455 {offsets = [0, 0], sizes = [14, 14], strides = [1, 1]} : vector<14x16xf32> to vector<14x14xf32>
    %458 = vector.broadcast %456 : f32 to vector<14x14xf32>
    %459 = arith.mulf %458, %457 : vector<14x14xf32>
    %460 = arith.addf %454, %459 : vector<14x14xf32>
    %c79 = arith.constant 79 : index
    %461 = memref.load %arg2[%c79] : memref<81xf32, #tpu.memory_space<smem>>
    %462 = vector.extract_strided_slice %455 {offsets = [0, 1], sizes = [14, 14], strides = [1, 1]} : vector<14x16xf32> to vector<14x14xf32>
    %463 = vector.broadcast %461 : f32 to vector<14x14xf32>
    %464 = arith.mulf %463, %462 : vector<14x14xf32>
    %465 = arith.addf %460, %464 : vector<14x14xf32>
    %c80 = arith.constant 80 : index
    %466 = memref.load %arg2[%c80] : memref<81xf32, #tpu.memory_space<smem>>
    %467 = vector.extract_strided_slice %455 {offsets = [0, 2], sizes = [14, 14], strides = [1, 1]} : vector<14x16xf32> to vector<14x14xf32>
    %468 = vector.broadcast %466 : f32 to vector<14x14xf32>
    %469 = arith.mulf %468, %467 : vector<14x14xf32>
    %470 = arith.addf %465, %469 : vector<14x14xf32>
    %c2_18 = arith.constant 2 : index
    %471 = memref.load %arg3[%c2_18] : memref<3xf32, #tpu.memory_space<smem>>
    %472 = vector.broadcast %471 : f32 to vector<14x14xf32>
    %473 = arith.addf %470, %472 : vector<14x14xf32>
    %cst_19 = arith.constant 0.000000e+00 : f32
    %474 = vector.broadcast %cst_19 : f32 to vector<14x14xf32>
    %475 = arith.maximumf %473, %474 : vector<14x14xf32>
    %c0_20 = arith.constant 0 : index
    %c2_21 = arith.constant 2 : index
    %c0_22 = arith.constant 0 : index
    %c0_23 = arith.constant 0 : index
    %476 = vector.load %arg4[%c0_20, %c2_21, %c0_22, %c0_23] : memref<1x3x14x14xf32, #tpu.memory_space<vmem>>, vector<1x1x14x14xf32>
    %477 = vector.shape_cast %476 : vector<1x1x14x14xf32> to vector<14x14xf32>
    %478 = vector.shape_cast %475 : vector<14x14xf32> to vector<1x1x14x14xf32>
    tpu.vector_store %arg4[%c0_20, %c2_21, %c0_22, %c0_23], %478 {strides = array<i32>} : memref<1x3x14x14xf32, #tpu.memory_space<vmem>>, vector<1x1x14x14xf32>,
    return
  }
  func.func @transform_0(%arg0: i32) -> (i32, i32, i32, i32) {
    %c0_i32 = arith.constant 0 : i32
    %c0_i32_0 = arith.constant 0 : i32
    %c0_i32_1 = arith.constant 0 : i32
    %c0_i32_2 = arith.constant 0 : i32
    return %arg0, %c0_i32, %c0_i32_0, %c0_i32_1 : i32, i32, i32, i32
  }
  func.func @transform_1(%arg0: i32) -> i32 {
    %c0_i32 = arith.constant 0 : i32
    %c0_i32_0 = arith.constant 0 : i32
    return %c0_i32 : i32
  }
  func.func @transform_2(%arg0: i32) -> i32 {
    %c0_i32 = arith.constant 0 : i32
    %c0_i32_0 = arith.constant 0 : i32
    return %c0_i32 : i32
  }
  func.func @transform_3(%arg0: i32) -> (i32, i32, i32, i32) {
    %c0_i32 = arith.constant 0 : i32
    %c0_i32_0 = arith.constant 0 : i32
    %c0_i32_1 = arith.constant 0 : i32
    %c0_i32_2 = arith.constant 0 : i32
    return %arg0, %c0_i32, %c0_i32_0, %c0_i32_1 : i32, i32, i32, i32
  }
}

</mosaic_0001>

<bundles_post_ra>
// kernel: tpu_custom_call.1
= control target key start
LH: loop header
LB: loop body
LE: loop exit
PB: predicated region body
PF: predicated region fallthrough
CT: control target
= control target key end

     0   :  { %8 = vsyncpa [#allocation3], 0  ;;  %s2479_s0 = inlined_call_operand.hbm [shape: f32[2,3,16,16], index: 0, kind: input, shape index: {}]   ;;  %s2480_s1 = inlined_call_operand.hbm [shape: f32[81], index: 1, kind: input, shape index: {}]   ;;  %s2481_s2 = inlined_call_operand.vmem [shape: f32[3], index: 2, kind: input, shape index: {}]   ;;  %s2482_s3 = inlined_call_operand.vmem [shape: f32[2,3,14,14], index: 3, kind: output, shape index: {}]  }
   0x1   :  { %10 = vsyncpa [#allocation3 + $0x1], 0 }
   0x2   :  { %11 = vsyncpa [#allocation4], 0 }
   0x3   :  { %12 = vsyncpa [#allocation5], 0  ;;  %s1801_s12 = smov 0   ;;  %s1803_s13 = smov 0  }
   0x4   :  { %s1805_s14 = smov 0   ;;  %s1807_s15 = smov 0  }
   0x5 LB: > { %s1820_s16 = sadd.s32 4294967295, %s1773_s15   ;;  %s1823_s17 = sadd.s32 1, %s1773_s15   ;;  %s1773_s15 = sphi %s1807_s15, %s2490_s15   ;;  %s1769_s14 = sphi %s1805_s14, %s2489_s14   ;;  %s1765_s13 = sphi %s1803_s13, %s2488_s13   ;;  %s1761_s12 = sphi %s1801_s12, %s2487_s12  }
   0x6   : > { %s22_s18 = ssub.s32 %s1773_s15, %s1823_s17  ;;  %s25_s19 = sadd.s32 1, %s1769_s14 }
   0x7   : > { %p23_p0 = scmp.eq.s32.totalorder %s22_s18, 0  ;;  %p32_p1 = scmp.ne.s32.totalorder %s1769_s14, %s1765_s13 }
   0x8   : > { %p33_p2 = scmp.eq.s32.totalorder %s1773_s15, 0  ;;  %p38_p3 = scmp.ne.s32.totalorder %s1765_s13, %s1761_s12 }
   0x9   : > { %s1833_s20 = scalar_select %p23_p0, %s1769_s14, %s25_s19  }
   0xa   : > { %p1835_p4 = por %p33_p2, %p32_p1  ;;  %p39_p5 = scmp.eq.s32.totalorder %s1820_s16, 0 }
   0xb   : > { %p1500_p6 = scmp.ge.s32.totalorder %s1773_s15, 1  ;;  %p117_p7 = scmp.lt.s32.totalorder %s1773_s15, 3 }
   0xc   : > { %p1844_p8 = por %p39_p5, %p38_p3  ;;  %s129_s26 = sshll.u32 %s2480_s1, 4  ;;  %s130_s26 = int_to_ptr.hbm [resolvable:$true] %s129_s26 }
   0xd   : > { %p1848_p9 = pnand %p1500_p6, %p117_p7  ;;  %p1624_p11 = scmp.lt.s32.totalorder %s1773_s15, 2 }
   0xe   : > { %s139_s29 = sshll.u32 %s2481_s2, 4  ;;  %s150_s4 = sand.u32 1, %s1769_s14   ;;  %s140_s29 = int_to_ptr.vmem [resolvable:$true] %s139_s29 }
   0xf   : > { %p1611_p10 = pneg %p1848_p9  ;;  %p1865_p13 = pnand %p1624_p11, %p1835_p4 }
  0x10   : > { %s1775_s5 = smov [#allocation6]   ;;  %s1776_s6 = smov [#allocation7]  }
  0x11   : > { %p1612_p12 = pnand %p1611_p10, %p39_p5  ;;  %s1597_s7 = smul.u32 48, %s150_s4 }
  0x12   : > { %s1598_s8 = smul.u32 48, %s1773_s15  ;;  %s151_s21 = scalar_lea.sflag [#allocation3], %s150_s4 }
  0x13   : > { %1614 = dma.hbm_to_smem (!%p1612_p12), %s130_s26, 16, %s1775_s5, [#allocation4]  }
  0x14   : > { %1617 = dma.vmem_to_smem (!%p1612_p12), %s140_s29, 16, %s1776_s6, [#allocation5]  }
  0x15   : > { %s159_s11 = scalar_lea.hbm %s2479_s0, %s1598_s8  ;;  %s154_s12 = scalar_lea.vmem [#allocation2], %s1597_s7 }
  0x16   : > { %s162_s18 = sshll.u32 %s154_s12, 4  ;;  %s160_s19 = sshll.u32 %s159_s11, 4  ;;  %s163_s18 = int_to_ptr.vmem [resolvable:$true] %s162_s18  ;;  %s161_s19 = int_to_ptr.hbm [resolvable:$true] %s160_s19 }
  0x17   : > { %s1701_s24 = sshra.s32 %s161_s19, 4  ;;  %p1705_p1 = pneg %p1865_p13  ;;  %s1702_s24 = int_to_ptr.hbm [resolvable:$true] %s1701_s24 }
  0x18   : > { %s1703_s25 = scalar_lea.hbm %s1702_s24, 48  ;;  %s1708_s27 = scalar_lea.hbm %s2479_s0, 96 }
  0x19   : > { %p1704_p0 = scmp.ne.s32.totalorder %s1702_s24, %s1703_s25  ;;  %p1709_p4 = scmp.lt.s32.totalorder %s1702_s24, %s2479_s0 }
  0x1a   : > { %p1710_p6 = scmp.lt.s32.totalorder %s1708_s27, %s1703_s25 }
  0x1b   : > { %p1706_p2 = pnand %p1705_p1, %p1704_p0 }
  0x1c   : > { %p1711_p7 = por %p1710_p6, %p1709_p4 }
  0x1d   : > { %p1707_p3 = pneg %p1706_p2 }
  0x1f   : > { %p1712_p10 = pnand %p1711_p7, %p1707_p3 }
  0x21   : > { %1715 = shalt.err (!%p1712_p10)
}
  0x22   : > { %s1777_s4 = smov 128   ;;  %s1778_s5 = smov 8  }
  0x23   : > { %1621 = dma.hbm_to_vmem [thread:$0]  (!%p1865_p13), %s161_s19, 768, %s163_s18, %s151_s21, %s1777_s4, %s1777_s4, %s1778_s5  }
  0x24   : > { %174 = sbr.rel (%p1848_p9) target bundleno = 462 (0x1ce), region = 32  ;;  %s176_s6 = sand.u32 (!%p1848_p9), 1, %s1765_s13  }
  0x25   : > { %s1599_s7 = smul.u32 (!%p1848_p9), 48, %s176_s6  ;;  %s177_s8 = scalar_lea.sflag (!%p1848_p9), [#allocation3], %s176_s6 }
  0x27   : > { %s1887_s9 = scalar_lea.vmem (!%p1848_p9), [#allocation2], %s1599_s7 }
  0x29   : > { %1748 = dma.done.wait (%p1844_p8), %s177_s8, 768  }
  0x2a   : > { %1750 = vsyncadd (%p1844_p8), %s177_s8, 4294966528 }
  0x2b   : > { %1752 = dma.done.wait (%p39_p5), [#allocation4], 16  }
  0x2c   : > { %1754 = vsyncadd (%p39_p5), [#allocation4], 4294967280 }
  0x2d   : > { %1756 = dma.done.wait (%p39_p5), [#allocation5], 16  }
  0x2e   : > { %1758 = vsyncadd (%p39_p5), [#allocation5], 4294967280 }
  0x2f   : > { %196 = sfence }
  0x30   : > { %s1510_s23 = sld [smem:[#allocation6 + $0x2]]  ;;  %v1902_v0 = vld [vmem:[%s1887_s9] sm:$0xff]  ;;  %v1907_v5 = vld [vmem:[%s1887_s9 + $0x8] sm:$0xff]  ;;  %s1779_s11 = smov 126   ;;  %vm266_vm0 = vcmask 1046528   ;;  %vm314_vm1 = vcmask 1045504  }
  0x31   : > { %s1509_s30 = sld [smem:[#allocation6 + $0x1]]  ;;  %s1780_s18 = smov 127   ;;  %v1935_v32 = vld [vmem:[%s1887_s9 + $0x18] sm:$0xff]  ;;  %v1938_v34 = vld [vmem:[%s1887_s9 + $0x10] sm:$0xff]  ;;  %vm618_vm2 = vcmask 113664   ;;  %vm620_vm3 = vcmask 111616  }
  0x32   : > { %s1512_s10 = sld [smem:[#allocation6 + $0x4]]  ;;  %p215_p5 = scmp.lt.s32.totalorder %s1820_s16, 1 }
  0x33   : > { %s1513_s22 = sld [smem:[#allocation6 + $0x5]] }
  0x34   : > { %s1516_s12 = sld [smem:[#allocation6 + $0x8]]  ;;  %s2492_s16 = smov (!%p215_p5, %s1820_s16), 1 }
  0x35   : > { %s1515_s19 = sld [smem:[#allocation6 + $0x7]] }
  0x36   : > { %v247_v1 = vstv %s1510_s23  ;;  %s1518_s21 = sld [smem:[#allocation6 + $0xa]] }
  0x37   : > { %v248_v2 = vmul.f32 %v247_v1, %v1902_v0  ;;  %v233_v3 = vstv %s1509_s30  ;;  %v249_v11 = vmul.f32 %v247_v1, %v1907_v5  ;;  %s1521_s24 = sld [smem:[#allocation6 + $0xd]]  ;;  %v1969_v1 = vld [vmem:[%s1887_s9 + $0x28] sm:$0xff] }
  0x38   : > { %v234_v4 = vmul.f32 %v233_v3, %v1902_v0  ;;  %v275_v6 = vstv %s1512_s10  ;;  %v235_v12 = vmul.f32 %v233_v3, %v1907_v5  ;;  %s1519_s25 = sld [smem:[#allocation6 + $0xb]]  ;;  %v1972_v3 = vld [vmem:[%s1887_s9 + $0x20] sm:$0xff] }
  0x39   : > { %252 = vrot.lane.b32.xlu1 %v248_v2, %s1779_s11  ;;  %v277_v7 = vmul.f32 %v275_v6, %v1907_v5  ;;  %v276_v8 = vmul.f32 %v275_v6, %v1902_v0  ;;  %v292_v9 = vstv %s1513_s22  ;;  %s1522_s26 = sld [smem:[#allocation6 + $0xe]] }
  0x3a   : > { %238 = vrot.lane.b32.xlu0 %v234_v4, %s1780_s18  ;;  %v293_v13 = vmul.f32 %v292_v9, %v1902_v0  ;;  %v294_v14 = vmul.f32 %v292_v9, %v1907_v5  ;;  %v340_v16 = vstv %s1516_s12  ;;  %s1524_s15 = sld [smem:[#allocation6 + $0x10]] }
  0x3b   : > { %v281_v10 = vrot.slane %v277_v7, 1  ;;  %v280_v15 = vrot.slane %v276_v8, 1  ;;  %v323_v17 = vstv %s1515_s19  ;;  %v341_v23 = vmul.f32 %v340_v16, %v1902_v0  ;;  %s1525_s27 = sld [smem:[#allocation6 + $0x11]] }
  0x3c   : > { %v298_v18 = vrot.slane %v294_v14, 1  ;;  %v297_v19 = vrot.slane %v293_v13, 1  ;;  %v324_v20 = vmul.f32 %v323_v17, %v1902_v0  ;;  %v325_v22 = vmul.f32 %v323_v17, %v1907_v5  ;;  %s1527_s28 = sld [smem:[#allocation6 + $0x13]] }
  0x3d   : > { %285 = vrot.lane.b32.xlu2 %v281_v10, %s1780_s18  ;;  %v282_v21 = vsel %vm266_vm0, %v280_v15, %v281_v10  ;;  %v342_v24 = vmul.f32 %v340_v16, %v1907_v5  ;;  %v345_v28 = vrot.slane %v341_v23, 2  ;;  %v363_v33 = vstv %s1518_s21  ;;  %s1530_s29 = sld [smem:[#allocation6 + $0x16]] }
  0x3e   : > { %v299_v25 = vsel %vm266_vm0, %v297_v19, %v298_v18  ;;  %v328_v26 = vrot.slane %v324_v20, 2  ;;  %v329_v27 = vrot.slane %v325_v22, 2  ;;  %v404_v35 = vstv %s1521_s24  ;;  %s1528_s4 = sld [smem:[#allocation6 + $0x14]] }
  0x3f   : > { %v346_v29 = vrot.slane %v342_v24, 2  ;;  %v365_v36 = vmul.f32 %v363_v33, %v1935_v32  ;;  %v364_v37 = vmul.f32 %v363_v33, %v1938_v34  ;;  %v405_v38 = vmul.f32 %v404_v35, %v1938_v34  ;;  %s1531_s5 = sld [smem:[#allocation6 + $0x17]] }
  0x40   : > { %v330_v30 = vsel %vm314_vm1, %v328_v26, %v329_v27  ;;  %v406_v39 = vmul.f32 %v404_v35, %v1935_v32  ;;  %v377_v40 = vstv %s1519_s25  ;;  %v421_v44 = vstv %s1522_s26  ;;  %s1533_s6 = sld [smem:[#allocation6 + $0x19]] }
  0x41   : > { %254 = vrot.lane.b32.xlu1 %v249_v11, %s1779_s11  ;;  %v347_v31 = vsel %vm314_vm1, %v345_v28, %v346_v29  ;;  %v409_v41 = vrot.slane %v405_v38, 1  ;;  %v378_v43 = vmul.f32 %v377_v40, %v1938_v34  ;;  %v379_v46 = vmul.f32 %v377_v40, %v1935_v32  ;;  %s1534_s7 = sld [smem:[#allocation6 + $0x1a]] }
  0x42   : > { %240 = vrot.lane.b32.xlu0 %v235_v12, %s1780_s18  ;;  %v410_v42 = vrot.slane %v406_v39, 1  ;;  %v422_v47 = vmul.f32 %v421_v44, %v1938_v34  ;;  %v423_v48 = vmul.f32 %v421_v44, %v1935_v32  ;;  %v451_v49 = vstv %s1524_s15  ;;  %s1536_s8 = sld [smem:[#allocation6 + $0x1c]] }
  0x43   : > { %v468_v52 = vstv %s1525_s27  ;;  %v452_v53 = vmul.f32 %v451_v49, %v1938_v34  ;;  %v453_v54 = vmul.f32 %v451_v49, %v1935_v32  ;;  %v491_v2 = vstv %s1527_s28  ;;  %s1539_s23 = sld [smem:[#allocation6 + $0x1f]] }
  0x44   : > { %v411_v45 = vsel %vm266_vm0, %v409_v41, %v410_v42  ;;  %v427_v50 = vrot.slane %v423_v48, 1  ;;  %v426_v51 = vrot.slane %v422_v47, 1  ;;  %v469_v55 = vmul.f32 %v468_v52, %v1938_v34  ;;  %s1537_s30 = sld [smem:[#allocation6 + $0x1d]] }
  0x45   : > { %283 = vrot.lane.b32.xlu2 %v282_v21, %s1780_s18  ;;  %v470_v56 = vmul.f32 %v468_v52, %v1935_v32  ;;  %v456_v58 = vrot.slane %v452_v53, 2  ;;  %v457_v59 = vrot.slane %v453_v54, 2  ;;  %v532_v4 = vstv %s1530_s29  ;;  %s1540_s10 = sld [smem:[#allocation6 + $0x20]] }
  0x46   : > { %v428_v57 = vsel %vm266_vm0, %v426_v51, %v427_v50  ;;  %v473_v60 = vrot.slane %v469_v55, 2  ;;  %v493_v6 = vmul.f32 %v491_v2, %v1969_v1  ;;  %v492_v7 = vmul.f32 %v491_v2, %v1972_v3  ;;  %s1542_s22 = sld [smem:[#allocation6 + $0x22]] }
  0x47   : > { %v474_v61 = vrot.slane %v470_v56, 2  ;;  %v458_v62 = vsel %vm314_vm1, %v456_v58, %v457_v59  ;;  %v533_v8 = vmul.f32 %v532_v4, %v1972_v3  ;;  %v534_v9 = vmul.f32 %v532_v4, %v1969_v1  ;;  %s1543_s12 = sld [smem:[#allocation6 + $0x23]] }
  0x48   : > { %v505_v10 = vstv %s1528_s4  ;;  %v549_v14 = vstv %s1531_s5  ;;  %v579_v19 = vstv %s1533_s6  ;;  %v596_v22 = vstv %s1534_s7  ;;  %s226_s19 = sld [smem:[#allocation6]] }
  0x49   : > { %302 = vrot.lane.b32.xlu1 %v298_v18, %s1779_s11  ;;  %v475_v63 = vsel %vm314_vm1, %v473_v60, %v474_v61  ;;  %v537_v11 = vrot.slane %v533_v8, 1  ;;  %v538_v12 = vrot.slane %v534_v9, 1  ;;  %v506_v13 = vmul.f32 %v505_v10, %v1972_v3  ;;  %s1511_s21 = sld [smem:[#allocation6 + $0x3]] }
  0x4a   : > { %300 = vrot.lane.b32.xlu0 %v299_v25, %s1779_s11  ;;  %v507_v16 = vmul.f32 %v505_v10, %v1969_v1  ;;  %v550_v17 = vmul.f32 %v549_v14, %v1972_v3  ;;  %v551_v18 = vmul.f32 %v549_v14, %v1969_v1  ;;  %v580_v23 = vmul.f32 %v579_v19, %v1972_v3  ;;  %s1545_s24 = sld [smem:[#allocation6 + $0x25]] }
  0x4b   : > { %v539_v15 = vsel %vm266_vm0, %v537_v11, %v538_v12  ;;  %v581_v24 = vmul.f32 %v579_v19, %v1969_v1  ;;  %v597_v25 = vmul.f32 %v596_v22, %v1972_v3  ;;  %v598_v26 = vmul.f32 %v596_v22, %v1969_v1  ;;  %s1548_s25 = sld [smem:[#allocation6 + $0x28]] }
  0x4c   : > { %v555_v20 = vrot.slane %v551_v18, 1  ;;  %v554_v21 = vrot.slane %v550_v17, 1  ;;  %v584_v28 = vrot.slane %v580_v23, 2  ;;  %v687_v47 = vstv %s1540_s10  ;;  %s2037_s26 = sld [smem:[#allocation6 + $0x26]] }
  0x4d   : > { %331 = vrot.lane.b32.xlu2 %v330_v30, %s1780_s18  ;;  %v601_v30 = vrot.slane %v597_v25, 2  ;;  %v689_v51 = vmul.f32 %v687_v47, %v1907_v5  ;;  %v717_v53 = vstv %s1542_s22  ;;  %v734_v56 = vstv %s1543_s12  ;;  %s2040_s15 = sld [smem:[#allocation6 + $0x6]] }
  0x4e   : > { %v719_v58 = vmul.f32 %v717_v53, %v1907_v5  ;;  %v736_v60 = vmul.f32 %v734_v56, %v1907_v5  ;;  %v227_v11 = vstv %s226_s19  ;;  %s2044_s27 = sld [smem:[#allocation6 + $0x29]] }
  0x4f   : > { %v693_v54 = vrot.slane %v689_v51, 1  ;;  %v229_v17 = vmul.f32 %v227_v11, %v1907_v5  ;;  %s2059_s28 = sld [smem:[#allocation6 + $0x2b]] }
  0x50   : > { %v723_v2 = vrot.slane %v719_v58, 2  ;;  %v757_v14 = vstv %s1545_s24  ;;  %s2063_s29 = sld [smem:[#allocation6 + $0x2c]] }
  0x51   : > { %348 = vrot.lane.b32.xlu1 %v347_v31, %s1779_s11  ;;  %v602_v31 = vrot.slane %v598_v26, 2  ;;  %v798_v18 = vstv %s1548_s25  ;;  %v759_v22 = vmul.f32 %v757_v14, %v1935_v32  ;;  %v758_v23 = vmul.f32 %v757_v14, %v1938_v34  ;;  %s2082_s4 = sld [smem:[#allocation6 + $0x9]] }
  0x52   : > { %333 = vrot.lane.b32.xlu0 %v329_v27, %s1780_s18  ;;  %v556_v27 = vsel %vm266_vm0, %v554_v21, %v555_v20  ;;  %v800_v25 = vmul.f32 %v798_v18, %v1935_v32  ;;  %s2085_s5 = sld [smem:[#allocation6 + $0xc]] }
  0x53   : > { %v603_v35 = vsel %vm314_vm1, %v601_v30, %v602_v31  ;;  %s2096_s6 = sld [smem:[#allocation6 + $0x2e]] }
  0x54   : > { %s2098_s7 = sld [smem:[#allocation6 + $0x31]] }
  0x55   : > { %350 = vrot.lane.b32.xlu2 %v346_v29, %s1779_s11  ;;  %v585_v29 = vrot.slane %v581_v24, 2  ;;  %v799_v24 = vmul.f32 %v798_v18, %v1938_v34  ;;  %s2138_s10 = sld [smem:[#allocation6 + $0x34]] }
  0x56   : > { %s2142_s22 = sld [smem:[#allocation6 + $0x35]] }
  0x57   : > { %v586_v33 = vsel %vm314_vm1, %v584_v28, %v585_v29  ;;  %s2149_s12 = sld [smem:[#allocation6 + $0x12]] }
  0x58   : > { %s2160_s19 = sld [smem:[#allocation6 + $0x15]] }
  0x59   : > { %370 = vrot.lane.b32.xlu1 %v365_v36, %s1780_s18  ;;  %v629_v36 = vstv %s1536_s8  ;;  %s2105_s8 = sld [smem:[#allocation6 + $0xf]] }
  0x5a   : > { %368 = vrot.lane.b32.xlu0 %v364_v37, %s1780_s18  ;;  %v670_v37 = vstv %s1539_s23  ;;  %v631_v38 = vmul.f32 %v629_v36, %v1907_v5  ;;  %v630_v39 = vmul.f32 %v629_v36, %v1902_v0  ;;  %v804_v36 = vrot.slane %v800_v25, 1  ;;  %s2116_s23 = sld [smem:[#allocation6 + $0x2f]] }
  0x5b   : > { %v671_v40 = vmul.f32 %v670_v37, %v1902_v0  ;;  %v672_v41 = vmul.f32 %v670_v37, %v1907_v5  ;;  %s2175_s24 = sld [smem:[#allocation6 + $0x37]] }
  0x5c   : > { %s2179_s25 = sld [smem:[#allocation6 + $0x3a]] }
  0x5d   : > { %382 = vrot.lane.b32.xlu2 %v378_v43, %s1779_s11  ;;  %v643_v43 = vstv %s1537_s30  ;;  %v675_v44 = vrot.slane %v671_v40, 1  ;;  %s2121_s30 = sld [smem:[#allocation6 + $0x32]] }
  0x5e   : > { %v645_v49 = vmul.f32 %v643_v43, %v1907_v5 }
  0x61   : > { %412 = vrot.lane.b32.xlu1 %v411_v45, %s1780_s18  ;;  %v676_v45 = vrot.slane %v672_v41, 1  ;;  %v815_v41 = vstv %s2044_s27  ;;  %s2212_s27 = sld [smem:[#allocation7]] }
  0x62   : > { %384 = vrot.lane.b32.xlu0 %v379_v46, %s1779_s11  ;;  %v644_v46 = vmul.f32 %v643_v43, %v1902_v0 }
  0x63   : > { %v677_v48 = vsel %vm266_vm0, %v675_v44, %v676_v45 }
  0x65   : > { %414 = vrot.lane.b32.xlu2 %v410_v42, %s1780_s18 }
  0x69   : > { %431 = vrot.lane.b32.xlu1 %v427_v50, %s1779_s11  ;;  %v688_v50 = vmul.f32 %v687_v47, %v1902_v0 }
  0x6a   : > { %429 = vrot.lane.b32.xlu0 %v428_v57, %s1779_s11  ;;  %v718_v57 = vmul.f32 %v717_v53, %v1902_v0 }
  0x6b   : > { %v692_v55 = vrot.slane %v688_v50, 1  ;;  %v817_v50 = vmul.f32 %v815_v41, %v1935_v32 }
  0x6d   : > { %459 = vrot.lane.b32.xlu2 %v458_v62, %s1780_s18  ;;  %v722_v62 = vrot.slane %v718_v57, 2  ;;  %v821_v57 = vrot.slane %v817_v50, 1 }
  0x6f   : > { %v724_v8 = vsel %vm314_vm1, %v722_v62, %v723_v2 }
  0x71   : > { %476 = vrot.lane.b32.xlu1 %v475_v63, %s1779_s11 }
  0x72   : > { %461 = vrot.lane.b32.xlu0 %v457_v59, %s1780_s18  ;;  %v735_v59 = vmul.f32 %v734_v56, %v1902_v0 }
  0x74   : > { %v739_v4 = vrot.slane %v735_v59, 2  ;;  %v845_v59 = vstv %s2059_s28  ;;  %s2215_s28 = sld [smem:[#allocation6 + $0x3d]] }
  0x75   : > { %478 = vrot.lane.b32.xlu2 %v474_v61, %s1779_s11  ;;  %v694_v61 = vsel %vm266_vm0, %v692_v55, %v693_v54 }
  0x79   : > { %498 = vrot.lane.b32.xlu1 %v493_v6, %s1780_s18  ;;  %v740_v6 = vrot.slane %v736_v60, 2 }
  0x7a   : > { %496 = vrot.lane.b32.xlu0 %v492_v7, %s1780_s18 }
  0x7b   : > { %v741_v10 = vsel %vm314_vm1, %v739_v4, %v740_v6  ;;  %v846_v4 = vmul.f32 %v845_v59, %v1938_v34 }
  0x7d   : > { %510 = vrot.lane.b32.xlu2 %v506_v13, %s1779_s11  ;;  %v261_v13 = vstv %s1511_s21  ;;  %s2172_s21 = sld [smem:[#allocation6 + $0x18]] }
  0x7e   : > { %v263_v19 = vmul.f32 %v261_v13, %v1907_v5 }
  0x80   : > { %v268_v28 = vrot.slane %v263_v19, 1 }
  0x81   : > { %540 = vrot.lane.b32.xlu1 %v539_v15, %s1780_s18  ;;  %v228_v15 = vmul.f32 %v227_v11, %v1902_v0 }
  0x82   : > { %512 = vrot.lane.b32.xlu0 %v507_v16, %s1779_s11 }
  0x85   : > { %542 = vrot.lane.b32.xlu2 %v538_v12, %s1780_s18 }
  0x89   : > { %559 = vrot.lane.b32.xlu1 %v555_v20, %s1779_s11  ;;  %v262_v20 = vmul.f32 %v261_v13, %v1902_v0  ;;  %v850_v13 = vrot.slane %v846_v4, 2 }
  0x8a   : > { %557 = vrot.lane.b32.xlu0 %v556_v27, %s1779_s11 }
  0x8d   : > { %587 = vrot.lane.b32.xlu2 %v586_v33, %s1780_s18  ;;  %v309_v33 = vstv %s2040_s15  ;;  %s2197_s15 = sld [smem:[#allocation6 + $0x3b]] }
  0x91   : > { %604 = vrot.lane.b32.xlu1 %v603_v35, %s1779_s11  ;;  %v803_v35 = vrot.slane %v799_v24, 1 }
  0x92   : > { %589 = vrot.lane.b32.xlu0 %v585_v29, %s1780_s18  ;;  %v267_v29 = vrot.slane %v262_v20, 1 }
  0x93   : > { %v805_v47 = vsel %vm266_vm0, %v803_v35, %v804_v36 }
  0x94   : > { %v269_v43 = vsel %vm266_vm0, %v267_v29, %v268_v28 }
  0x95   : > { %606 = vrot.lane.b32.xlu2 %v602_v31, %s1779_s11  ;;  %v771_v31 = vstv %s2037_s26  ;;  %s2192_s26 = sld [smem:[#allocation6 + $0x38]] }
  0x96   : > { %v772_v37 = vmul.f32 %v771_v31, %v1938_v34 }
  0x97   : > { %v2007_v42 = vpop.permute.xlu2 %285 }
  0x99   : > { %636 = vrot.lane.b32.xlu1 %v631_v38, %s1780_s18 }
  0x9a   : > { %634 = vrot.lane.b32.xlu0 %v630_v39, %s1780_s18 }
  0x9d   : > { %648 = vrot.lane.b32.xlu2 %v644_v46, %s1779_s11  ;;  %v311_v46 = vmul.f32 %v309_v33, %v1907_v5 }
  0x9f   : > { %v2017_v52 = vpop.permute.xlu2 %283  ;;  %v316_v56 = vrot.slane %v311_v46, 2 }
  0xa1   : > { %678 = vrot.lane.b32.xlu1 %v677_v48, %s1780_s18  ;;  %v773_v48 = vmul.f32 %v771_v31, %v1935_v32 }
  0xa2   : > { %650 = vrot.lane.b32.xlu0 %v645_v49, %s1779_s11  ;;  %v816_v49 = vmul.f32 %v815_v41, %v1938_v34 }
  0xa4   : > { %v820_v58 = vrot.slane %v816_v49, 1 }
  0xa5   : > { %680 = vrot.lane.b32.xlu2 %v676_v45, %s1780_s18  ;;  %v310_v45 = vmul.f32 %v309_v33, %v1902_v0 }
  0xa6   : > { %v822_v11 = vsel %vm266_vm0, %v820_v58, %v821_v57 }
  0xa7   : > { %v2027_v63 = vpop.permute.xlu2 %331  ;;  %v315_v55 = vrot.slane %v310_v45, 2 }
  0xa9   : > { %697 = vrot.lane.b32.xlu1 %v693_v54, %s1779_s11 }
  0xaa   : > { %695 = vrot.lane.b32.xlu0 %v694_v61, %s1779_s11 }
  0xab   : > { %v253_v7 = vpop.permute.xlu1 %252 }
  0xac   : > { %v239_v9 = vpop.permute.xlu0 %238 }
  0xad   : > { %725 = vrot.lane.b32.xlu2 %v724_v8, %s1780_s18  ;;  %v244_v26 = vadd.f32 %v239_v9, %v228_v15  ;;  %v847_v8 = vmul.f32 %v845_v59, %v1935_v32  ;;  %v317_v9 = vsel %vm314_vm1, %v315_v55, %v316_v56  ;;  %v899_v59 = vstv %s2116_s23  ;;  %s1575_s23 = sld [smem:[#allocation6 + $0x40]] }
  0xaf   : > { %v2034_v12 = vpop.permute.xlu2 %350  ;;  %v258_v38 = vadd.f32 %v253_v7, %v244_v26  ;;  %v391_v26 = vstv %s2085_s5  ;;  %s2397_s5 = sld [smem:[#allocation6 + $0x2d]] }
  0xb0   : > { %v392_v31 = vmul.f32 %v391_v26, %v1938_v34  ;;  %v393_v33 = vmul.f32 %v391_v26, %v1935_v32 }
  0xb1   : > { %742 = vrot.lane.b32.xlu1 %v741_v10, %s1779_s11  ;;  %v272_v51 = vadd.f32 %v269_v43, %v258_v38 }
  0xb2   : > { %727 = vrot.lane.b32.xlu0 %v723_v2, %s1780_s18  ;;  %v862_v2 = vstv %s2063_s29  ;;  %v396_v41 = vrot.slane %v392_v31, 1  ;;  %v397_v43 = vrot.slane %v393_v33, 1  ;;  %s2220_s29 = sld [smem:[#allocation6 + $0x3e]] }
  0xb3   : > { %v255_v16 = vpop.permute.xlu1 %254  ;;  %v289_v60 = vadd.f32 %v2017_v52, %v272_v51  ;;  %v863_v10 = vmul.f32 %v862_v2, %v1938_v34  ;;  %v864_v52 = vmul.f32 %v862_v2, %v1935_v32  ;;  %v900_v2 = vmul.f32 %v899_v59, %v1972_v3 }
  0xb4   : > { %v241_v21 = vpop.permute.xlu0 %240 }
  0xb5   : > { %744 = vrot.lane.b32.xlu2 %v740_v6, %s1779_s11  ;;  %v245_v27 = vadd.f32 %v241_v21, %v229_v17  ;;  %v867_v17 = vrot.slane %v863_v10, 2  ;;  %v868_v18 = vrot.slane %v864_v52, 2 }
  0xb7   : > { %v2053_v30 = vpop.permute.xlu2 %382  ;;  %v259_v39 = vadd.f32 %v255_v16, %v245_v27  ;;  %v851_v16 = vrot.slane %v847_v8, 2  ;;  %v869_v27 = vsel %vm314_vm1, %v867_v17, %v868_v18 }
  0xb9   : > { %764 = vrot.lane.b32.xlu1 %v759_v22, %s1780_s18  ;;  %v273_v53 = vadd.f32 %v268_v28, %v259_v39  ;;  %v852_v21 = vsel %vm314_vm1, %v850_v13, %v851_v16  ;;  %v357_v22 = vstv %s2082_s4  ;;  %s1600_s4 = smul.u32 48, %s2492_s16  ;;  %s1556_s16 = sld [smem:[#allocation6 + $0x30]] }
  0xba   : > { %762 = vrot.lane.b32.xlu0 %v758_v23, %s1780_s18  ;;  %v358_v29 = vmul.f32 %v357_v22, %v1938_v34 }
  0xbb   : > { %v303_v40 = vpop.permute.xlu1 %302  ;;  %v290_v61 = vadd.f32 %v2007_v42, %v273_v53  ;;  %v398_v53 = vsel %vm266_vm0, %v396_v41, %v397_v43 }
  0xbc   : > { %v301_v44 = vpop.permute.xlu0 %300 }
  0xbd   : > { %776 = vrot.lane.b32.xlu2 %v772_v37, %s1779_s11  ;;  %v306_v7 = vadd.f32 %v301_v44, %v289_v60  ;;  %v307_v42 = vadd.f32 %v303_v40, %v290_v61  ;;  %v885_v37 = vstv %s2096_s6  ;;  %v926_v40 = vstv %s2098_s7  ;;  %s2246_s6 = scalar_lea.vmem %s2482_s3, %s1600_s4  ;;  %s2250_s7 = sld [smem:[#allocation6 + $0x1b]] }
  0xbe   : > { %v887_v46 = vmul.f32 %v885_v37, %v1969_v1  ;;  %v927_v49 = vmul.f32 %v926_v40, %v1972_v3  ;;  %v928_v50 = vmul.f32 %v926_v40, %v1969_v1  ;;  %s2390_s4 = sld [smem:[#allocation6 + $0x50]] }
  0xbf   : > { %v2073_v54 = vpop.permute.xlu2 %414  ;;  %v320_v15 = vadd.f32 %v317_v9, %v306_v7  ;;  %v321_v19 = vadd.f32 %v316_v56, %v307_v42  ;;  %v901_v42 = vmul.f32 %v899_v59, %v1969_v1 }
  0xc0   : > { %v931_v61 = vrot.slane %v927_v49, 1 }
  0xc1   : > { %806 = vrot.lane.b32.xlu1 %v805_v47, %s1780_s18  ;;  %v337_v24 = vadd.f32 %v2027_v63, %v320_v15  ;;  %v886_v47 = vmul.f32 %v885_v37, %v1972_v3  ;;  %v485_v37 = vstv %s2149_s12  ;;  %s2272_s12 = sld [smem:[#allocation6 + $0x44]] }
  0xc2   : > { %778 = vrot.lane.b32.xlu0 %v773_v48, %s1779_s11  ;;  %v438_v48 = vstv %s2105_s8  ;;  %s1538_s8 = sld [smem:[#allocation6 + $0x1e]] }
  0xc3   : > { %v349_v62 = vpop.permute.xlu1 %348  ;;  %v439_v58 = vmul.f32 %v438_v48, %v1938_v34  ;;  %v440_v60 = vmul.f32 %v438_v48, %v1935_v32 }
  0xc4   : > { %v334_v6 = vpop.permute.xlu0 %333  ;;  %v354_v28 = vadd.f32 %v349_v62, %v337_v24  ;;  %v932_v62 = vrot.slane %v928_v50, 1  ;;  %v487_v50 = vmul.f32 %v485_v37, %v1969_v1 }
  0xc5   : > { %808 = vrot.lane.b32.xlu2 %v804_v36, %s1780_s18  ;;  %v338_v25 = vadd.f32 %v334_v6, %v321_v19  ;;  %v359_v36 = vmul.f32 %v357_v22, %v1935_v32  ;;  %v943_v6 = vstv %s2121_s30  ;;  %v443_v9 = vrot.slane %v439_v58, 2  ;;  %s1578_s30 = sld [smem:[#allocation6 + $0x43]] }
  0xc6   : > { %v360_v38 = vadd.f32 %v358_v29, %v354_v28  ;;  %v444_v10 = vrot.slane %v440_v60, 2  ;;  %v933_v52 = vsel %vm266_vm0, %v931_v61, %v932_v62  ;;  %v944_v15 = vmul.f32 %v943_v6, %v1972_v3 }
  0xc7   : > { %v2092_v14 = vpop.permute.xlu2 %459  ;;  %v355_v63 = vadd.f32 %v2034_v12, %v338_v25  ;;  %v990_v25 = vstv %s2142_s22  ;;  %s2270_s22 = sld [smem:[#allocation6 + $0x21]] }
  0xc8   : > { %v445_v19 = vsel %vm314_vm1, %v443_v9, %v444_v10  ;;  %v948_v24 = vrot.slane %v944_v15, 1  ;;  %v991_v29 = vmul.f32 %v990_v25, %v1972_v3  ;;  %v992_v31 = vmul.f32 %v990_v25, %v1969_v1 }
  0xc9   : > { %825 = vrot.lane.b32.xlu1 %v821_v57, %s1779_s11  ;;  %v361_v12 = vadd.f32 %v359_v36, %v355_v63 }
  0xca   : > { %823 = vrot.lane.b32.xlu0 %v822_v11, %s1779_s11  ;;  %v945_v11 = vmul.f32 %v943_v6, %v1969_v1 }
  0xcb   : > { %v371_v20 = vpop.permute.xlu1 %370 }
  0xcc   : > { %v369_v23 = vpop.permute.xlu0 %368  ;;  %v375_v51 = vadd.f32 %v371_v20, %v361_v12  ;;  %v949_v20 = vrot.slane %v945_v11, 1 }
  0xcd   : > { %853 = vrot.lane.b32.xlu2 %v852_v21, %s1780_s18  ;;  %v374_v45 = vadd.f32 %v369_v23, %v360_v38  ;;  %v973_v21 = vstv %s2138_s10  ;;  %s2266_s10 = sld [smem:[#allocation6 + $0x41]] }
  0xce   : > { %v974_v26 = vmul.f32 %v973_v21, %v1972_v3  ;;  %v975_v28 = vmul.f32 %v973_v21, %v1969_v1  ;;  %v950_v63 = vsel %vm266_vm0, %v948_v24, %v949_v20 }
  0xcf   : > { %v2111_v35 = vpop.permute.xlu2 %478  ;;  %v388_v56 = vadd.f32 %v2053_v30, %v374_v45 }
  0xd0   : > { %v978_v36 = vrot.slane %v974_v26, 2  ;;  %v979_v41 = vrot.slane %v975_v28, 2  ;;  %v1080_v26 = vstv %s2197_s15  ;;  %s2340_s15 = sld [smem:[#allocation6 + $0x4c]] }
  0xd1   : > { %870 = vrot.lane.b32.xlu1 %v869_v27, %s1779_s11  ;;  %v401_v7 = vadd.f32 %v398_v53, %v388_v56 }
  0xd2   : > { %855 = vrot.lane.b32.xlu0 %v851_v16, %s1780_s18 }
  0xd3   : > { %v413_v39 = vpop.permute.xlu1 %412 }
  0xd4   : > { %v385_v44 = vpop.permute.xlu0 %384  ;;  %v418_v13 = vadd.f32 %v413_v39, %v401_v7 }
  0xd5   : > { %872 = vrot.lane.b32.xlu2 %v868_v18, %s1779_s11  ;;  %v389_v57 = vadd.f32 %v385_v44, %v375_v51  ;;  %v996_v44 = vrot.slane %v992_v31, 2 }
  0xd7   : > { %v2130_v55 = vpop.permute.xlu2 %510  ;;  %v402_v8 = vadd.f32 %v397_v43, %v389_v57  ;;  %v995_v43 = vrot.slane %v991_v29, 2 }
  0xd9   : > { %892 = vrot.lane.b32.xlu1 %v887_v46, %s1780_s18  ;;  %v419_v17 = vadd.f32 %v2073_v54, %v402_v8  ;;  %v486_v46 = vmul.f32 %v485_v37, %v1972_v3  ;;  %v997_v51 = vsel %vm314_vm1, %v995_v43, %v996_v44 }
  0xda   : > { %890 = vrot.lane.b32.xlu0 %v886_v47, %s1780_s18  ;;  %v519_v47 = vstv %s2160_s19  ;;  %s2295_s19 = sld [smem:[#allocation6 + $0x46]] }
  0xdb   : > { %v432_v4 = vpop.permute.xlu1 %431  ;;  %v520_v53 = vmul.f32 %v519_v47, %v1972_v3  ;;  %v521_v56 = vmul.f32 %v519_v47, %v1969_v1  ;;  %v1127_v47 = vstv %s2220_s29  ;;  %s2363_s29 = sld [smem:[#allocation6 + $0x4d]] }
  0xdc   : > { %v430_v30 = vpop.permute.xlu0 %429  ;;  %v436_v22 = vadd.f32 %v432_v4, %v419_v17 }
  0xdd   : > { %904 = vrot.lane.b32.xlu2 %v900_v2, %s1779_s11  ;;  %v435_v18 = vadd.f32 %v430_v30, %v418_v13  ;;  %v524_v61 = vrot.slane %v520_v53, 1  ;;  %v1022_v2 = vstv %s2175_s24  ;;  %v1063_v30 = vstv %s2179_s25  ;;  %s2317_s24 = sld [smem:[#allocation6 + $0x24]] }
  0xde   : > { %v449_v33 = vadd.f32 %v444_v10, %v436_v22  ;;  %v1023_v13 = vmul.f32 %v1022_v2, %v1902_v0  ;;  %v1064_v15 = vmul.f32 %v1063_v30, %v1902_v0  ;;  %v1065_v17 = vmul.f32 %v1063_v30, %v1907_v5  ;;  %s2324_s25 = sld [smem:[#allocation6 + $0x27]] }
  0xdf   : > { %v2151_v16 = vpop.permute.xlu2 %542  ;;  %v448_v54 = vadd.f32 %v445_v19, %v435_v18 }
  0xe0   : > { %v1068_v21 = vrot.slane %v1064_v15, 1  ;;  %v1069_v22 = vrot.slane %v1065_v17, 1  ;;  %v2275_v17 = vld [vmem:[%s1887_s9] sm:$0xff] }
  0xe1   : > { %934 = vrot.lane.b32.xlu1 %v933_v52, %s1780_s18  ;;  %v465_v39 = vadd.f32 %v2092_v14, %v448_v54  ;;  %v980_v14 = vsel %vm314_vm1, %v978_v36, %v979_v41 }
  0xe2   : > { %906 = vrot.lane.b32.xlu0 %v901_v42, %s1779_s11  ;;  %v1024_v42 = vmul.f32 %v1022_v2, %v1907_v5  ;;  %v1070_v31 = vsel %vm266_vm0, %v1068_v21, %v1069_v22 }
  0xe3   : > { %v477_v23 = vpop.permute.xlu1 %476 }
  0xe4   : > { %v462_v27 = vpop.permute.xlu0 %461  ;;  %v482_v12 = vadd.f32 %v477_v23, %v465_v39  ;;  %v1081_v39 = vmul.f32 %v1080_v26, %v1902_v0 }
  0xe5   : > { %936 = vrot.lane.b32.xlu2 %v932_v62, %s1780_s18  ;;  %v466_v40 = vadd.f32 %v462_v27, %v449_v33  ;;  %v525_v62 = vrot.slane %v521_v56, 1  ;;  %v1129_v56 = vmul.f32 %v1127_v47, %v1907_v5 }
  0xe6   : > { %v488_v57 = vadd.f32 %v486_v46, %v482_v12  ;;  %v1085_v46 = vrot.slane %v1081_v39, 1 }
  0xe7   : > { %v2168_v38 = vpop.permute.xlu2 %587  ;;  %v483_v49 = vadd.f32 %v2111_v35, %v466_v40  ;;  %v566_v35 = vstv %s2172_s21  ;;  %v526_v11 = vsel %vm266_vm0, %v524_v61, %v525_v62  ;;  %v1133_v2 = vrot.slane %v1129_v56, 2  ;;  %s2299_s21 = sld [smem:[#allocation6 + $0x47]] }
  0xe8   : > { %v567_v8 = vmul.f32 %v566_v35, %v1972_v3  ;;  %v568_v9 = vmul.f32 %v566_v35, %v1969_v1 }
  0xe9   : > { %953 = vrot.lane.b32.xlu1 %v949_v20, %s1779_s11  ;;  %v489_v59 = vadd.f32 %v487_v50, %v483_v49  ;;  %v1036_v20 = vstv %s2192_s26  ;;  %s2338_s26 = sld [smem:[#allocation6 + $0x49]] }
  0xea   : > { %951 = vrot.lane.b32.xlu0 %v950_v63, %s1779_s11  ;;  %v571_v3 = vrot.slane %v567_v8, 2  ;;  %v572_v18 = vrot.slane %v568_v9, 2  ;;  %v1037_v23 = vmul.f32 %v1036_v20, %v1902_v0  ;;  %v1038_v33 = vmul.f32 %v1036_v20, %v1907_v5 }
  0xeb   : > { %v499_v45 = vpop.permute.xlu1 %498  ;;  %v1082_v63 = vmul.f32 %v1080_v26, %v1907_v5 }
  0xec   : > { %v497_v48 = vpop.permute.xlu0 %496  ;;  %v503_v4 = vadd.f32 %v499_v45, %v489_v59  ;;  %v573_v54 = vsel %vm314_vm1, %v571_v3, %v572_v18 }
  0xed   : > { %981 = vrot.lane.b32.xlu2 %v980_v14, %s1780_s18  ;;  %v502_v60 = vadd.f32 %v497_v48, %v488_v57  ;;  %v1086_v43 = vrot.slane %v1082_v63, 1 }
  0xef   : > { %v2188_v58 = vpop.permute.xlu2 %606  ;;  %v516_v10 = vadd.f32 %v2130_v55, %v502_v60  ;;  %v1087_v59 = vsel %vm266_vm0, %v1085_v46, %v1086_v43 }
  0xf1   : > { %998 = vrot.lane.b32.xlu1 %v997_v51, %s1779_s11  ;;  %v529_v55 = vadd.f32 %v526_v11, %v516_v10  ;;  %v623_v10 = vstv %s2250_s7  ;;  %s1559_s7 = sld [smem:[#allocation6 + $0x33]] }
  0xf2   : > { %983 = vrot.lane.b32.xlu0 %v979_v41, %s1780_s18  ;;  %v613_v41 = vstv %s2212_s27  ;;  %v624_v3 = vmul.f32 %v2275_v17, %v623_v10  ;;  %s2347_s27 = sld [smem:[#allocation6 + $0x2a]] }
  0xf3   : > { %v541_v6 = vpop.permute.xlu1 %540 }
  0xf4   : > { %v513_v7 = vpop.permute.xlu0 %512  ;;  %v546_v24 = vadd.f32 %v541_v6, %v529_v55 }
  0xf5   : > { %v517_v52 = vadd.f32 %v513_v7, %v503_v4  ;;  %1000 = vrot.lane.b32.xlu2 %v996_v44, %s1779_s11  ;;  %v1110_v44 = vstv %s2215_s28  ;;  %s2358_s28 = sld [smem:[#allocation6 + $0x4a]] }
  0xf6   : > { %v1111_v14 = vmul.f32 %v1110_v44, %v1902_v0  ;;  %v1112_v51 = vmul.f32 %v1110_v44, %v1907_v5 }
  0xf7   : > { %v2208_v1 = vpop.permute.xlu2 %648  ;;  %v530_v19 = vadd.f32 %v525_v62, %v517_v52  ;;  %v657_v52 = vstv %s1538_s8  ;;  %s1568_s8 = sld [smem:[#allocation6 + $0x39]] }
  0xf8   : > { %v1115_v60 = vrot.slane %v1111_v14, 2  ;;  %v1116_v62 = vrot.slane %v1112_v51, 2  ;;  %v659_v55 = vmul.f32 %v657_v52, %v1907_v5 }
  0xf9   : > { %1029 = vrot.lane.b32.xlu1 %v1024_v42, %s1780_s18  ;;  %v547_v28 = vadd.f32 %v2151_v16, %v530_v19  ;;  %v1150_v42 = vstv %s1575_s23  ;;  %s1571_s23 = sld [smem:[#allocation6 + $0x3c]] }
  0xfa   : > { %1027 = vrot.lane.b32.xlu0 %v1023_v13, %s1780_s18  ;;  %v1117_v30 = vsel %vm314_vm1, %v1115_v60, %v1116_v62  ;;  %v1191_v13 = vstv %s1578_s30  ;;  %v1152_v19 = vmul.f32 %v1150_v42, %v1935_v32  ;;  %v1151_v20 = vmul.f32 %v1150_v42, %v1938_v34  ;;  %s1574_s30 = sld [smem:[#allocation6 + $0x3f]] }
  0xfb   : > { %v560_v25 = vpop.permute.xlu1 %559  ;;  %v1192_v21 = vmul.f32 %v1191_v13, %v1938_v34  ;;  %v663_v5 = vrot.slane %v659_v55, 1  ;;  %v751_v55 = vstv %s2317_s24  ;;  %s1592_s24 = sld [smem:[#allocation7 + $0x2]] }
  0xfc   : > { %v558_v27 = vpop.permute.xlu0 %557  ;;  %v564_v36 = vadd.f32 %v560_v25, %v547_v28  ;;  %v704_v28 = vstv %s2270_s22  ;;  %s1580_s22 = sld [smem:[#allocation6 + $0x45]] }
  0xfd   : > { %v563_v29 = vadd.f32 %v558_v27, %v546_v24  ;;  %1041 = vrot.lane.b32.xlu2 %v1037_v23, %s1779_s11  ;;  %v2286_v23 = vld [vmem:[%s1887_s9 + $0x8] sm:$0xff]  ;;  %v705_v44 = vmul.f32 %v2275_v17, %v704_v28 }
  0xfe   : > { %v577_v45 = vadd.f32 %v572_v18, %v564_v36  ;;  %v658_v18 = vmul.f32 %v2275_v17, %v657_v52  ;;  %v625_v24 = vmul.f32 %v2286_v23, %v623_v10 }
  0xff   : > { %v576_v37 = vadd.f32 %v573_v54, %v563_v29  ;;  %v2230_v40 = vpop.permute.xlu2 %680  ;;  %v1164_v54 = vstv %s2266_s10  ;;  %v1196_v29 = vrot.slane %v1192_v21, 1  ;;  %s1577_s10 = sld [smem:[#allocation6 + $0x42]] }
 0x100   : > { %v662_v27 = vrot.slane %v658_v18, 1  ;;  %v1166_v46 = vmul.f32 %v1164_v54, %v1935_v32 }
 0x101   : > { %1071 = vrot.lane.b32.xlu1 %v1070_v31, %s1780_s18  ;;  %v593_v16 = vadd.f32 %v2168_v38, %v576_v37  ;;  %v1128_v38 = vmul.f32 %v1127_v47, %v1902_v0  ;;  %v1208_v37 = vstv %s2272_s12  ;;  %s1583_s12 = sld [smem:[#allocation6 + $0x48]] }
 0x102   : > { %1043 = vrot.lane.b32.xlu0 %v1038_v33, %s1779_s11  ;;  %v1165_v33 = vmul.f32 %v1164_v54, %v1938_v34  ;;  %v1210_v47 = vmul.f32 %v1208_v37, %v1935_v32  ;;  %v1209_v14 = vmul.f32 %v1208_v37, %v1938_v34 }
 0x103   : > { %v605_v12 = vpop.permute.xlu1 %604 }
 0x104   : > { %v610_v48 = vadd.f32 %v605_v12, %v593_v16  ;;  %v590_v49 = vpop.permute.xlu0 %589  ;;  %v706_v12 = vmul.f32 %v2286_v23, %v704_v28 }
 0x105   : > { %v594_v50 = vadd.f32 %v590_v49, %v577_v45  ;;  %1073 = vrot.lane.b32.xlu2 %v1069_v22, %s1780_s18  ;;  %v1193_v22 = vmul.f32 %v1191_v13, %v1935_v32 }
 0x106   : > { %v614_v53 = vadd.f32 %v613_v41, %v610_v48  ;;  %v710_v51 = vrot.slane %v706_v12, 2  ;;  %v2370_v12 = vld [vmem:[%s1887_s9 + $0x20] sm:$0xff] }
 0x107   : > { %v611_v57 = vadd.f32 %v2188_v58, %v594_v50  ;;  %v2252_v0 = vpop.permute.xlu2 %725  ;;  %v1132_v58 = vrot.slane %v1128_v38, 2  ;;  %v1197_v31 = vrot.slane %v1193_v22, 1  ;;  %v709_v50 = vrot.slane %v705_v44, 2 }
 0x108   : > { %v616_v35 = vmax.f32 %v614_v53, 0.0  ;;  %v1214_v53 = vrot.slane %v1210_v47, 1  ;;  %v1238_v38 = vstv %s2295_s19  ;;  %v785_v22 = vstv %s2324_s25  ;;  %s1586_s19 = sld [smem:[#allocation6 + $0x4b]] }
 0x109   : > { %v615_v61 = vadd.f32 %v613_v41, %v611_v57  ;;  %1090 = vrot.lane.b32.xlu1 %v1086_v43, %s1779_s11  ;;  %v1134_v8 = vsel %vm314_vm1, %v1132_v58, %v1133_v2  ;;  %v664_v41 = vsel %vm266_vm0, %v662_v27, %v663_v5  ;;  %v1198_v45 = vsel %vm266_vm0, %v1196_v29, %v1197_v31  ;;  %v2321_v58 = vld [vmem:[%s1887_s9 + $0x18] sm:$0xff] }
 0x10a   : > { %619 = vst.msk [vmem:[%s2246_s6] sm:$0xff] %vm618_vm2, %v616_v35  ;;  %1088 = vrot.lane.b32.xlu0 %v1087_v59, %s1779_s11  ;;  %v1213_v57 = vrot.slane %v1209_v14, 1  ;;  %v1255_v59 = vstv %s2299_s21  ;;  %v1239_v60 = vmul.f32 %v1238_v38, %v1938_v34  ;;  %v787_v54 = vmul.f32 %v2321_v58, %v785_v22  ;;  %s1589_s21 = sld [smem:[#allocation6 + $0x4e]] }
 0x10b   : > { %v617_v4 = vmax.f32 %v615_v61, 0.0  ;;  %v637_v6 = vpop.permute.xlu1 %636  ;;  %v1257_v34 = vmul.f32 %v2321_v58, %v1255_v59  ;;  %v753_v29 = vmul.f32 %v2321_v58, %v751_v55 }
 0x10c   : > { %v635_v7 = vpop.permute.xlu0 %634  ;;  %v641_v63 = vadd.f32 %v637_v6, %v625_v24  ;;  %v2328_v6 = vld [vmem:[%s1887_s9 + $0x10] sm:$0xff] }
 0x10d   : > { %621 = vst.msk [vmem:[%s2246_s6 + $0x8] sm:$0x3f] %vm620_vm3, %v617_v4  ;;  %1118 = vrot.lane.b32.xlu2 %v1117_v30, %s1780_s18  ;;  %v640_v26 = vadd.f32 %v635_v7, %v624_v3  ;;  %v711_v4 = vsel %vm314_vm1, %v709_v50, %v710_v51  ;;  %v1256_v30 = vmul.f32 %v2328_v6, %v1255_v59  ;;  %v1261_v13 = vrot.slane %v1257_v34, 2 }
 0x10e   : > { %v752_v27 = vmul.f32 %v2328_v6, %v751_v55 }
 0x10f   : > { %v2263_v9 = vpop.permute.xlu2 %744  ;;  %v654_v16 = vadd.f32 %v2208_v1, %v640_v26 }
 0x111   : > { %1135 = vrot.lane.b32.xlu1 %v1134_v8, %s1779_s11  ;;  %v667_v48 = vadd.f32 %v664_v41, %v654_v16  ;;  %v1243_v8 = vrot.slane %v1239_v60, 2 }
 0x112   : > { %1120 = vrot.lane.b32.xlu0 %v1116_v62, %s1780_s18 }
 0x113   : > { %v679_v11 = vpop.permute.xlu1 %678 }
 0x114   : > { %v651_v15 = vpop.permute.xlu0 %650  ;;  %v684_v56 = vadd.f32 %v679_v11, %v667_v48  ;;  %v1260_v11 = vrot.slane %v1256_v30, 2 }
 0x115   : > { %1137 = vrot.lane.b32.xlu2 %v1133_v2, %s1779_s11  ;;  %v655_v43 = vadd.f32 %v651_v15, %v641_v63  ;;  %v1240_v2 = vmul.f32 %v2321_v58, %v1238_v38 }
 0x116   : > { %v1262_v24 = vsel %vm314_vm1, %v1260_v11, %v1261_v13 }
 0x117   : > { %v2289_v25 = vpop.permute.xlu2 %776  ;;  %v668_v49 = vadd.f32 %v663_v5, %v655_v43  ;;  %v1244_v42 = vrot.slane %v1240_v2, 2  ;;  %v786_v5 = vmul.f32 %v2328_v6, %v785_v22  ;;  %v2366_v43 = vld [vmem:[%s1887_s9 + $0x28] sm:$0xff]  ;;  %s2386_s9 = sld [smem:[#allocation6 + $0x4f]] }
 0x119   : > { %1157 = vrot.lane.b32.xlu1 %v1152_v19, %s1780_s18  ;;  %v685_v61 = vadd.f32 %v2230_v40, %v668_v49  ;;  %v1215_v40 = vsel %vm266_vm0, %v1213_v57, %v1214_v53  ;;  %v1245_v18 = vsel %vm314_vm1, %v1243_v8, %v1244_v42  ;;  %v790_v37 = vrot.slane %v786_v5, 1 }
 0x11a   : > { %1155 = vrot.lane.b32.xlu0 %v1151_v20, %s1780_s18 }
 0x11b   : > { %v698_v36 = vpop.permute.xlu1 %697 }
 0x11c   : > { %v696_v39 = vpop.permute.xlu0 %695  ;;  %v702_v7 = vadd.f32 %v698_v36, %v685_v61  ;;  %v1319_v36 = vstv %s2340_s15  ;;  %v1336_v61 = vstv %s2363_s29 }
 0x11d   : > { %1169 = vrot.lane.b32.xlu2 %v1165_v33, %s1779_s11  ;;  %v701_v62 = vadd.f32 %v696_v39, %v684_v56  ;;  %v791_v39 = vrot.slane %v787_v54, 1  ;;  %v1320_v47 = vmul.f32 %v2370_v12, %v1319_v36  ;;  %v1321_v14 = vmul.f32 %v2366_v43, %v1319_v36 }
 0x11e   : > { %v715_v15 = vadd.f32 %v710_v51, %v702_v7  ;;  %v1292_v56 = vstv %s2358_s28 }
 0x11f   : > { %v2310_v1 = vpop.permute.xlu2 %808  ;;  %v714_v52 = vadd.f32 %v711_v4, %v701_v62  ;;  %v792_v49 = vsel %vm266_vm0, %v790_v37, %v791_v39  ;;  %v1324_v57 = vrot.slane %v1320_v47, 1  ;;  %v1325_v59 = vrot.slane %v1321_v14, 1 }
 0x120   : > { %v1293_v60 = vmul.f32 %v2370_v12, %v1292_v56  ;;  %v1294_v7 = vmul.f32 %v2366_v43, %v1292_v56 }
 0x121   : > { %1199 = vrot.lane.b32.xlu1 %v1198_v45, %s1780_s18  ;;  %v731_v20 = vadd.f32 %v2252_v0, %v714_v52  ;;  %v1326_v34 = vsel %vm266_vm0, %v1324_v57, %v1325_v59  ;;  %v1337_v52 = vmul.f32 %v2370_v12, %v1336_v61  ;;  %v960_v57 = vstv %s1559_s7 }
 0x122   : > { %1171 = vrot.lane.b32.xlu0 %v1166_v46, %s1779_s11  ;;  %v832_v46 = vstv %s2347_s27 }
 0x123   : > { %v743_v32 = vpop.permute.xlu1 %742  ;;  %v833_v38 = vmul.f32 %v2328_v6, %v832_v46 }
 0x124   : > { %v728_v35 = vpop.permute.xlu0 %727  ;;  %v748_v26 = vadd.f32 %v743_v32, %v731_v20  ;;  %v834_v32 = vmul.f32 %v2321_v58, %v832_v46  ;;  %v1341_v20 = vrot.slane %v1337_v52, 1 }
 0x125   : > { %1201 = vrot.lane.b32.xlu2 %v1197_v31, %s1780_s18  ;;  %v732_v21 = vadd.f32 %v728_v35, %v715_v15  ;;  %v1278_v31 = vstv %s2338_s26  ;;  %v837_v4 = vrot.slane %v833_v38, 2 }
 0x126   : > { %v754_v33 = vadd.f32 %v752_v27, %v748_v26  ;;  %v1280_v44 = vmul.f32 %v2366_v43, %v1278_v31  ;;  %v1279_v45 = vmul.f32 %v2370_v12, %v1278_v31  ;;  %v838_v30 = vrot.slane %v834_v32, 2 }
 0x127   : > { %v2334_v10 = vpop.permute.xlu2 %853  ;;  %v749_v0 = vadd.f32 %v2263_v9, %v732_v21  ;;  %v1383_v21 = vstv %s2390_s4  ;;  %v879_v31 = vstv %s2397_s5 }
 0x128   : > { %v839_v15 = vsel %vm314_vm1, %v837_v4, %v838_v30  ;;  %v1384_v27 = vmul.f32 %v2370_v12, %v1383_v21  ;;  %v1385_v5 = vmul.f32 %v2366_v43, %v1383_v21 }
 0x129   : > { %1218 = vrot.lane.b32.xlu1 %v1214_v53, %s1779_s11  ;;  %v755_v9 = vadd.f32 %v753_v29, %v749_v0 }
 0x12a   : > { %1216 = vrot.lane.b32.xlu0 %v1215_v40, %s1779_s11  ;;  %v1338_v40 = vmul.f32 %v2366_v43, %v1336_v61 }
 0x12b   : > { %v765_v3 = vpop.permute.xlu1 %764 }
 0x12c   : > { %v763_v19 = vpop.permute.xlu0 %762  ;;  %v769_v48 = vadd.f32 %v765_v3, %v755_v9  ;;  %v1342_v3 = vrot.slane %v1338_v40, 1 }
 0x12d   : > { %1246 = vrot.lane.b32.xlu2 %v1245_v18, %s1780_s18  ;;  %v768_v41 = vadd.f32 %v763_v19, %v754_v33  ;;  %v1366_v18 = vstv %s2386_s9 }
 0x12e   : > { %v1367_v22 = vmul.f32 %v2370_v12, %v1366_v18  ;;  %v1343_v0 = vsel %vm266_vm0, %v1341_v20, %v1342_v3 }
 0x12f   : > { %v2353_v28 = vpop.permute.xlu2 %872  ;;  %v782_v51 = vadd.f32 %v2289_v25, %v768_v41 }
 0x130   : > { %v1371_v29 = vrot.slane %v1367_v22, 2 }
 0x131   : > { %1263 = vrot.lane.b32.xlu1 %v1262_v24, %s1779_s11  ;;  %v795_v62 = vadd.f32 %v792_v49, %v782_v51 }
 0x132   : > { %1248 = vrot.lane.b32.xlu0 %v1244_v42, %s1780_s18 }
 0x133   : > { %v807_v63 = vpop.permute.xlu1 %806 }
 0x134   : > { %v779_v16 = vpop.permute.xlu0 %778  ;;  %v812_v8 = vadd.f32 %v807_v63, %v795_v62  ;;  %v962_v62 = vmul.f32 %v2366_v43, %v960_v57 }
 0x135   : > { %1265 = vrot.lane.b32.xlu2 %v1261_v13, %s1779_s11  ;;  %v783_v53 = vadd.f32 %v779_v16, %v769_v48  ;;  %v1389_v16 = vrot.slane %v1385_v5, 2 }
 0x137   : > { %v2378_v50 = vpop.permute.xlu2 %904  ;;  %v796_v2 = vadd.f32 %v791_v39, %v783_v53  ;;  %v1388_v39 = vrot.slane %v1384_v27, 2 }
 0x139   : > { %1285 = vrot.lane.b32.xlu1 %v1280_v44, %s1780_s18  ;;  %v813_v11 = vadd.f32 %v2310_v1, %v796_v2  ;;  %v1368_v1 = vmul.f32 %v2366_v43, %v1366_v18  ;;  %v880_v44 = vmul.f32 %v2370_v12, %v879_v31  ;;  %v1390_v48 = vsel %vm314_vm1, %v1388_v39, %v1389_v16 }
 0x13a   : > { %1283 = vrot.lane.b32.xlu0 %v1279_v45, %s1780_s18  ;;  %v913_v45 = vstv %s1556_s16  ;;  %v1050_v39 = vstv %s1568_s8 }
 0x13b   : > { %v826_v35 = vpop.permute.xlu1 %825  ;;  %v1372_v37 = vrot.slane %v1368_v1, 2  ;;  %v914_v49 = vmul.f32 %v2370_v12, %v913_v45  ;;  %v915_v51 = vmul.f32 %v2366_v43, %v913_v45  ;;  %v1051_v45 = vmul.f32 %v2275_v17, %v1050_v39 }
 0x13c   : > { %v824_v25 = vpop.permute.xlu0 %823  ;;  %v830_v55 = vadd.f32 %v826_v35, %v813_v11 }
 0x13d   : > { %1297 = vrot.lane.b32.xlu2 %v1293_v60, %s1779_s11  ;;  %v829_v13 = vadd.f32 %v824_v25, %v812_v8  ;;  %v1373_v46 = vsel %vm314_vm1, %v1371_v29, %v1372_v37  ;;  %v961_v25 = vmul.f32 %v2370_v12, %v960_v57 }
 0x13e   : > { %v843_v54 = vadd.f32 %v838_v30, %v830_v55 }
 0x13f   : > { %v2399_v42 = vpop.permute.xlu2 %936  ;;  %v842_v26 = vadd.f32 %v839_v15, %v829_v13 }
 0x141   : > { %1327 = vrot.lane.b32.xlu1 %v1326_v34, %s1780_s18  ;;  %v859_v63 = vadd.f32 %v2334_v10, %v842_v26  ;;  %v881_v10 = vmul.f32 %v2366_v43, %v879_v31  ;;  %v965_v34 = vrot.slane %v961_v25, 2 }
 0x142   : > { %1299 = vrot.lane.b32.xlu0 %v1294_v7, %s1779_s11  ;;  %v966_v7 = vrot.slane %v962_v62, 2 }
 0x143   : > { %v871_v19 = vpop.permute.xlu1 %870 }
 0x144   : > { %v856_v24 = vpop.permute.xlu0 %855  ;;  %v876_v9 = vadd.f32 %v871_v19, %v859_v63 }
 0x145   : > { %1329 = vrot.lane.b32.xlu2 %v1325_v59, %s1780_s18  ;;  %v860_v36 = vadd.f32 %v856_v24, %v843_v54  ;;  %v919_v59 = vrot.slane %v915_v51, 1 }
 0x146   : > { %v882_v53 = vadd.f32 %v880_v44, %v876_v9 }
 0x147   : > { %v982_v33 = vpop.permute.xlu2 %981  ;;  %v877_v14 = vadd.f32 %v2353_v28, %v860_v36  ;;  %v918_v28 = vrot.slane %v914_v49, 1 }
 0x149   : > { %1346 = vrot.lane.b32.xlu1 %v1342_v3, %s1779_s11  ;;  %v883_v56 = vadd.f32 %v881_v10, %v877_v14  ;;  %v920_v30 = vsel %vm266_vm0, %v918_v28, %v919_v59  ;;  %v967_v3 = vsel %vm314_vm1, %v965_v34, %v966_v7  ;;  %v1055_v10 = vrot.slane %v1051_v45, 1 }
 0x14a   : > { %1344 = vrot.lane.b32.xlu0 %v1343_v0, %s1779_s11 }
 0x14b   : > { %v893_v41 = vpop.permute.xlu1 %892 }
 0x14c   : > { %v891_v47 = vpop.permute.xlu0 %890  ;;  %v897_v60 = vadd.f32 %v893_v41, %v883_v56 }
 0x14d   : > { %1374 = vrot.lane.b32.xlu2 %v1373_v46, %s1780_s18  ;;  %v896_v32 = vadd.f32 %v891_v47, %v882_v53  ;;  %v1052_v46 = vmul.f32 %v2286_v23, %v1050_v39  ;;  %v1097_v53 = vstv %s1571_s23 }
 0x14e   : > { %v1098_v28 = vmul.f32 %v2275_v17, %v1097_v53 }
 0x14f   : > { %v1001_v38 = vpop.permute.xlu2 %1000  ;;  %v910_v2 = vadd.f32 %v2378_v50, %v896_v32 }
 0x150   : > { %v1102_v25 = vrot.slane %v1098_v28, 2 }
 0x151   : > { %1391 = vrot.lane.b32.xlu1 %v1390_v48, %s1779_s11  ;;  %v923_v8 = vadd.f32 %v920_v30, %v910_v2  ;;  %v1056_v48 = vrot.slane %v1052_v46, 1 }
 0x152   : > { %1376 = vrot.lane.b32.xlu0 %v1372_v37, %s1780_s18  ;;  %s1562_s18 = sld [smem:[#allocation7 + $0x1]] }
 0x153   : > { %v935_v35 = vpop.permute.xlu1 %934  ;;  %v1057_v57 = vsel %vm266_vm0, %v1055_v10, %v1056_v48 }
 0x154   : > { %v907_v61 = vpop.permute.xlu0 %906  ;;  %v940_v11 = vadd.f32 %v935_v35, %v923_v8 }
 0x155   : > { %v911_v4 = vadd.f32 %v907_v61, %v897_v60  ;;  %1393 = vrot.lane.b32.xlu2 %v1389_v16, %s1779_s11  ;;  %s1565_s11 = sld [smem:[#allocation6 + $0x36]] }
 0x157   : > { %v1042_v40 = vpop.permute.xlu2 %1041  ;;  %v924_v52 = vadd.f32 %v919_v59, %v911_v4  ;;  %v1099_v59 = vmul.f32 %v2286_v23, %v1097_v53 }
 0x158   : > { %v1007_v22 = vstv %s1562_s18 }
 0x159   : > { %v941_v18 = vadd.f32 %v2399_v42, %v924_v52  ;;  %v1103_v62 = vrot.slane %v1099_v59, 2 }
 0x15b   : > { %v954_v13 = vpop.permute.xlu1 %953 }
 0x15c   : > { %v952_v15 = vpop.permute.xlu0 %951  ;;  %v958_v55 = vadd.f32 %v954_v13, %v941_v18 }
 0x15d   : > { %v957_v50 = vadd.f32 %v952_v15, %v940_v11 }
 0x15e   : > { %v971_v26 = vadd.f32 %v966_v7, %v958_v55 }
 0x15f   : > { %v970_v19 = vadd.f32 %v967_v3, %v957_v50  ;;  %v1074_v20 = vpop.permute.xlu2 %1073 }
 0x161   : > { %v987_v21 = vadd.f32 %v982_v33, %v970_v19  ;;  %v1016_v33 = vstv %s1565_s11  ;;  %v1178_v19 = vstv %s1577_s10 }
 0x162   : > { %v1017_v44 = vmul.f32 %v2275_v17, %v1016_v33  ;;  %v1018_v47 = vmul.f32 %v2286_v23, %v1016_v33  ;;  %v1144_v23 = vstv %s1574_s30 }
 0x163   : > { %v999_v24 = vpop.permute.xlu1 %998  ;;  %v1145_v55 = vmul.f32 %v2328_v6, %v1144_v23 }
 0x164   : > { %v1004_v1 = vadd.f32 %v999_v24, %v987_v21  ;;  %v984_v27 = vpop.permute.xlu0 %983  ;;  %v1180_v24 = vmul.f32 %v2321_v58, %v1178_v19 }
 0x165   : > { %v988_v5 = vadd.f32 %v984_v27, %v971_v26 }
 0x166   : > { %v1008_v54 = vadd.f32 %v1007_v22, %v1004_v1 }
 0x167   : > { %v1005_v0 = vadd.f32 %v1001_v38, %v988_v5  ;;  %v1119_v42 = vpop.permute.xlu2 %1118 }
 0x168   : > { %v1010_v29 = vmax.f32 %v1008_v54, 0.0 }
 0x169   : > { %v1009_v31 = vadd.f32 %v1007_v22, %v1005_v0  ;;  %v1179_v22 = vmul.f32 %v2328_v6, %v1178_v19 }
 0x16a   : > { %1563 = vst.msk [vmem:[%s2246_s6 + $0x10] sm:$0xff] %vm618_vm2, %v1010_v29 }
 0x16b   : > { %v1011_v63 = vmax.f32 %v1009_v31, 0.0  ;;  %v1030_v36 = vpop.permute.xlu1 %1029  ;;  %v1183_v29 = vrot.slane %v1179_v22, 1  ;;  %v1184_v31 = vrot.slane %v1180_v24, 1 }
 0x16c   : > { %v1028_v37 = vpop.permute.xlu0 %1027  ;;  %v1034_v49 = vadd.f32 %v1030_v36, %v1018_v47 }
 0x16d   : > { %1564 = vst.msk [vmem:[%s2246_s6 + $0x18] sm:$0x3f] %vm620_vm3, %v1011_v63  ;;  %v1033_v14 = vadd.f32 %v1028_v37, %v1017_v44  ;;  %v1225_v63 = vstv %s1580_s22  ;;  %v1185_v33 = vsel %vm266_vm0, %v1183_v29, %v1184_v31 }
 0x16e   : > { %v1226_v39 = vmul.f32 %v2328_v6, %v1225_v63 }
 0x16f   : > { %v1138_v41 = vpop.permute.xlu2 %1137  ;;  %v1047_v56 = vadd.f32 %v1042_v40, %v1033_v14  ;;  %v1104_v40 = vsel %vm314_vm1, %v1102_v25, %v1103_v62  ;;  %v1306_v25 = vstv %s1586_s19 }
 0x170   : > { %v1230_v47 = vrot.slane %v1226_v39, 2 }
 0x171   : > { %v1060_v35 = vadd.f32 %v1057_v57, %v1047_v56  ;;  %v1272_v57 = vstv %s1583_s12 }
 0x173   : > { %v1072_v16 = vpop.permute.xlu1 %1071 }
 0x174   : > { %v1044_v9 = vpop.permute.xlu0 %1043  ;;  %v1077_v2 = vadd.f32 %v1072_v16, %v1060_v35  ;;  %v1227_v16 = vmul.f32 %v2321_v58, %v1225_v63  ;;  %v1400_v63 = vstv %s1592_s24 }
 0x175   : > { %v1048_v32 = vadd.f32 %v1044_v9, %v1034_v49 }
 0x176   : > { %v1231_v14 = vrot.slane %v1227_v16, 2 }
 0x177   : > { %v1170_v60 = vpop.permute.xlu2 %1169  ;;  %v1061_v61 = vadd.f32 %v1056_v48, %v1048_v32 }
 0x179   : > { %v1078_v34 = vadd.f32 %v1074_v20, %v1061_v61  ;;  %v1146_v20 = vmul.f32 %v2321_v58, %v1144_v23  ;;  %v1273_v61 = vmul.f32 %v2370_v12, %v1272_v57 }
 0x17b   : > { %v1091_v51 = vpop.permute.xlu1 %1090 }
 0x17c   : > { %v1089_v38 = vpop.permute.xlu0 %1088  ;;  %v1095_v8 = vadd.f32 %v1091_v51, %v1078_v34  ;;  %v1232_v51 = vsel %vm314_vm1, %v1230_v47, %v1231_v14  ;;  %v1308_v34 = vmul.f32 %v2366_v43, %v1306_v25 }
 0x17d   : > { %v1094_v7 = vadd.f32 %v1089_v38, %v1077_v2 }
 0x17e   : > { %v1108_v17 = vadd.f32 %v1103_v62, %v1095_v8 }
 0x17f   : > { %v1202_v52 = vpop.permute.xlu2 %1201  ;;  %v1107_v11 = vadd.f32 %v1104_v40, %v1094_v7 }
 0x181   : > { %v1124_v3 = vadd.f32 %v1119_v42, %v1107_v11  ;;  %v1353_v11 = vstv %s1589_s21 }
 0x183   : > { %v1136_v4 = vpop.permute.xlu1 %1135 }
 0x184   : > { %v1121_v30 = vpop.permute.xlu0 %1120  ;;  %v1141_v50 = vadd.f32 %v1136_v4, %v1124_v3  ;;  %v1274_v4 = vmul.f32 %v2366_v43, %v1272_v57 }
 0x185   : > { %v1125_v18 = vadd.f32 %v1121_v30, %v1108_v17  ;;  %v1307_v30 = vmul.f32 %v2370_v12, %v1306_v25 }
 0x186   : > { %v1147_v1 = vadd.f32 %v1145_v55, %v1141_v50  ;;  %v1355_v50 = vmul.f32 %v2366_v43, %v1353_v11 }
 0x187   : > { %v1142_v21 = vadd.f32 %v1138_v41, %v1125_v18  ;;  %v1247_v26 = vpop.permute.xlu2 %1246  ;;  %v1311_v17 = vrot.slane %v1307_v30, 1  ;;  %v1354_v18 = vmul.f32 %v2370_v12, %v1353_v11 }
 0x188   : > { %v1359_v22 = vrot.slane %v1355_v50, 2 }
 0x189   : > { %v1148_v54 = vadd.f32 %v1146_v20, %v1142_v21  ;;  %v1358_v20 = vrot.slane %v1354_v18, 2 }
 0x18b   : > { %v1158_v13 = vpop.permute.xlu1 %1157 }
 0x18c   : > { %v1156_v15 = vpop.permute.xlu0 %1155  ;;  %v1162_v42 = vadd.f32 %v1158_v13, %v1148_v54  ;;  %v1312_v13 = vrot.slane %v1308_v34, 1 }
 0x18d   : > { %v1161_v0 = vadd.f32 %v1156_v15, %v1147_v1 }
 0x18e   : > { %v1313_v21 = vsel %vm266_vm0, %v1311_v17, %v1312_v13 }
 0x18f   : > { %v1175_v36 = vadd.f32 %v1170_v60, %v1161_v0  ;;  %v1266_v44 = vpop.permute.xlu2 %1265  ;;  %v1360_v0 = vsel %vm314_vm1, %v1358_v20, %v1359_v22 }
 0x191   : > { %v1188_v45 = vadd.f32 %v1185_v33, %v1175_v36 }
 0x193   : > { %v1200_v27 = vpop.permute.xlu1 %1199 }
 0x194   : > { %v1172_v5 = vpop.permute.xlu0 %1171  ;;  %v1205_v10 = vadd.f32 %v1200_v27, %v1188_v45 }
 0x195   : > { %v1176_v37 = vadd.f32 %v1172_v5, %v1162_v42 }
 0x197   : > { %v1189_v46 = vadd.f32 %v1184_v31, %v1176_v37  ;;  %v1298_v32 = vpop.permute.xlu2 %1297 }
 0x199   : > { %v1206_v48 = vadd.f32 %v1202_v52, %v1189_v46 }
 0x19b   : > { %v1219_v9 = vpop.permute.xlu1 %1218 }
 0x19c   : > { %v1217_v41 = vpop.permute.xlu0 %1216  ;;  %v1223_v53 = vadd.f32 %v1219_v9, %v1206_v48 }
 0x19d   : > { %v1222_v49 = vadd.f32 %v1217_v41, %v1205_v10 }
 0x19e   : > { %v1236_v58 = vadd.f32 %v1231_v14, %v1223_v53 }
 0x19f   : > { %v1235_v6 = vadd.f32 %v1232_v51, %v1222_v49  ;;  %v1330_v40 = vpop.permute.xlu2 %1329 }
 0x1a1   : > { %v1252_v28 = vadd.f32 %v1247_v26, %v1235_v6 }
 0x1a3   : > { %v1264_v38 = vpop.permute.xlu1 %1263 }
 0x1a4   : > { %v1249_v56 = vpop.permute.xlu0 %1248  ;;  %v1269_v60 = vadd.f32 %v1264_v38, %v1252_v28 }
 0x1a5   : > { %v1253_v59 = vadd.f32 %v1249_v56, %v1236_v58 }
 0x1a6   : > { %v1275_v7 = vadd.f32 %v1273_v61, %v1269_v60 }
 0x1a7   : > { %v1270_v2 = vadd.f32 %v1266_v44, %v1253_v59  ;;  %v1375_v1 = vpop.permute.xlu2 %1374 }
 0x1a9   : > { %v1276_v8 = vadd.f32 %v1274_v4, %v1270_v2 }
 0x1ab   : > { %v1286_v35 = vpop.permute.xlu1 %1285 }
 0x1ac   : > { %v1284_v62 = vpop.permute.xlu0 %1283  ;;  %v1290_v23 = vadd.f32 %v1286_v35, %v1276_v8 }
 0x1ad   : > { %v1289_v52 = vadd.f32 %v1284_v62, %v1275_v7 }
 0x1af   : > { %v1303_v55 = vadd.f32 %v1298_v32, %v1289_v52  ;;  %v1394_v16 = vpop.permute.xlu2 %1393 }
 0x1b1   : > { %v1316_v24 = vadd.f32 %v1313_v21, %v1303_v55 }
 0x1b3   : > { %v1328_v15 = vpop.permute.xlu1 %1327 }
 0x1b4   : > { %v1300_v3 = vpop.permute.xlu0 %1299  ;;  %v1333_v27 = vadd.f32 %v1328_v15, %v1316_v24 }
 0x1b5   : > { %v1304_v19 = vadd.f32 %v1300_v3, %v1290_v23 }
 0x1b7   : > { %v1317_v26 = vadd.f32 %v1312_v13, %v1304_v19 }
 0x1b9   : > { %v1334_v29 = vadd.f32 %v1330_v40, %v1317_v26 }
 0x1bb   : > { %v1347_v5 = vpop.permute.xlu1 %1346 }
 0x1bc   : > { %v1345_v54 = vpop.permute.xlu0 %1344  ;;  %v1351_v31 = vadd.f32 %v1347_v5, %v1334_v29 }
 0x1bd   : > { %v1350_v12 = vadd.f32 %v1345_v54, %v1333_v27 }
 0x1be   : > { %v1364_v37 = vadd.f32 %v1359_v22, %v1351_v31 }
 0x1bf   : > { %v1363_v43 = vadd.f32 %v1360_v0, %v1350_v12 }
 0x1c1   : > { %v1380_v42 = vadd.f32 %v1375_v1, %v1363_v43 }
 0x1c3   : > { %v1392_v36 = vpop.permute.xlu1 %1391 }
 0x1c4   : > { %v1397_v33 = vadd.f32 %v1392_v36, %v1380_v42  ;;  %v1377_v39 = vpop.permute.xlu0 %1376 }
 0x1c5   : > { %v1381_v9 = vadd.f32 %v1377_v39, %v1364_v37 }
 0x1c6   : > { %v1401_v41 = vadd.f32 %v1400_v63, %v1397_v33 }
 0x1c7   : > { %v1398_v44 = vadd.f32 %v1394_v16, %v1381_v9 }
 0x1c8   : > { %v1403_v45 = vmax.f32 %v1401_v41, 0.0 }
 0x1c9   : > { %v1402_v46 = vadd.f32 %v1400_v63, %v1398_v44 }
 0x1ca   : > { %1593 = vst.msk [vmem:[%s2246_s6 + $0x20] sm:$0xff] %vm618_vm2, %v1403_v45 }
 0x1cb   : > { %v1404_v47 = vmax.f32 %v1402_v46, 0.0 }
 0x1cd   : > { %1594 = vst.msk [vmem:[%s2246_s6 + $0x28] sm:$0x3f] %vm620_vm3, %v1404_v47 }
 0x1ce PF: > { %p15_p8 = scmp.ge.s32.totalorder %s1823_s17, 4   ;;  %s2487_s12 = smov %s1765_s13 }
 0x1cf   : > { %s2488_s13 = smov %s1769_s14  ;;  %s2489_s14 = smov %s1833_s20 }
 0x1d0   : > { %s2490_s15 = smov %s1823_s17  ;;  %17 = sbr.rel (!%p15_p8) target bundleno = 5 (0x5), region = 84 }
 0x1d5   :  { %1429 = vsyncpa [#allocation3], 1 }
 0x1d6   :  { %1431 = vsyncpa [#allocation3 + $0x1], 1 }
 0x1d7   :  { %1432 = vsyncpa [#allocation4], 1 }
 0x1d8   :  { %1434 = vsyncpa [#allocation4 + $0x1], 1 }
 0x1d9   :  { %1435 = vsyncpa [#allocation5], 1 }
 0x1da   :  { %1437 = vsyncpa [#allocation5 + $0x1], 1 }

</bundles_post_ra>
